<compile_context>
chip_gen: v6e
topology: v6e:2x2x1
jax: 0.10.0
libtpu: 0.0.40
codegen_flags: <defaults>
</compile_context>

<pallas_src>
import functools
import math
import numpy as np
import jax
import jax.numpy as jnp
from jax.experimental import pallas as pl
from jax.experimental.pallas import tpu as pltpu


# ----------------------------- Pallas kernel -----------------------------

def _variance_diffusion_kernel(
    # per-batch activations (block index depends only on b -> fetched once per batch)
    x_ref, g_ref, y_ref, noise_ref, nonpad_ref, emb_ref, sched_ref,
    # resident (layer-independent) weights, bf16 except biases
    wc_ref, bc_ref, win_ref, bin_ref, wo1_ref, bo1_ref, wo2_ref, bo2_ref,
    # streamed per-layer weights (block index = l)
    wfuse_ref, bfuse_ref, wres_ref, bres_ref, wskip_ref, bskip_ref,
    # output
    loss_ref,
    # VMEM scratch carried across the layer axis
    h_s, skip_s, vcat_s,
    *, num_layers,
):
    f32 = jnp.float32
    bf16 = jnp.bfloat16
    l = pl.program_id(1)
    R = h_s.shape[1]

    @pl.when(l == 0)
    def _prologue():
        # cond = x + Conv1d(g, kernel=1)   (1x1 conv == channel matmul)
        cond = (x_ref[0]
                + jnp.dot(g_ref[0].astype(bf16), wc_ref[...],
                          preferred_element_type=f32)
                + bc_ref[...])                                        # (T, Cin) f32

        # q_sample: x_noisy = sqrt(acp[t]) * y + sqrt(1 - acp[t]) * noise
        sa = sched_ref[0, :, 0:1]                                     # (1, 1)
        sb = sched_ref[0, :, 1:2]                                     # (1, 1)
        x_noisy = sa * y_ref[0] + sb * noise_ref[0]                   # (T,1) bcast -> (T, M)

        # denoiser input projection
        h_s[...] = jnp.maximum(
            jnp.dot(x_noisy.astype(bf16), win_ref[...],
                    preferred_element_type=f32) + bin_ref[...], 0.0)
        skip_s[...] = jnp.zeros_like(skip_s)

        # stash cond (bf16) in the tail K-columns of the fused-matmul input slab (written once)
        vcat_s[:, R:] = cond.astype(bf16)

    # ---- one gated residual layer per grid step (its weights streamed for this step) ----
    vcat_s[:, :R] = (h_s[...] + emb_ref[0]).astype(bf16)              # [h + step_emb | cond]
    z = (jnp.dot(vcat_s[...], wfuse_ref[0], preferred_element_type=f32)
         + bfuse_ref[0])                                              # (T, 2R) f32
    v = jax.nn.sigmoid(z[:, :R]) * jnp.tanh(z[:, R:])                 # (T, R) f32
    v_bf = v.astype(bf16)
    h_s[...] = (h_s[...]
                + jnp.dot(v_bf, wres_ref[0], preferred_element_type=f32)
                + bres_ref[0]) * (1.0 / math.sqrt(2.0))
    skip_s[...] = (skip_s[...]
                   + jnp.dot(v_bf, wskip_ref[0], preferred_element_type=f32)
                   + bskip_ref[0])

    @pl.when(l == num_layers - 1)
    def _epilogue():
        skip = skip_s[...] * (1.0 / math.sqrt(num_layers))
        o = jnp.maximum(
            jnp.dot(skip.astype(bf16), wo1_ref[...],
                    preferred_element_type=f32) + bo1_ref[...], 0.0)
        pred = (jnp.dot(o.astype(bf16), wo2_ref[...],
                        preferred_element_type=f32) + bo2_ref[...])   # (T, M)
        # masked L1 partial sum; nonpad (T,1) is 1 on valid frames (PyTorch passes ~mask)
        diff = jnp.abs(noise_ref[0] - pred) * nonpad_ref[0]
        loss_ref[...] = jnp.sum(diff).reshape(1, 1, 1)


# ----------------------------- JAX glue -----------------------------

def cosine_noise_schedule(timesteps=100, max_beta=0.06, s=0.008):
    steps = timesteps + 1
    x = np.linspace(0, steps, steps)
    ac = np.cos(((x / steps) + s) / (1 + s) * np.pi * 0.5) ** 2
    ac = ac / ac[0]
    betas = 1.0 - (ac[1:] / ac[:-1])
    betas = np.clip(betas, 0.0, max_beta)
    alphas = 1.0 - betas
    acp = np.cumprod(alphas)
    return (jnp.asarray(np.sqrt(acp), jnp.float32),
            jnp.asarray(np.sqrt(1.0 - acp), jnp.float32))


def init_params(key, gin, cin, m, r, layers):
    ks = jax.random.split(key, 12)

    def w(k, shape, fan_in):
        return (jax.random.normal(k, shape, jnp.float32) / math.sqrt(fan_in)).astype(jnp.float32)

    return dict(
        wc=w(ks[0], (gin, cin), gin),             bc=jnp.zeros((1, cin), jnp.float32),
        win=w(ks[1], (m, r), m),                  bin=jnp.zeros((1, r), jnp.float32),
        wdil=w(ks[2], (layers, r, 2 * r), r),     bdil=jnp.zeros((layers, 1, 2 * r), jnp.float32),
        wcnd=w(ks[3], (layers, cin, 2 * r), cin), bcnd=jnp.zeros((layers, 1, 2 * r), jnp.float32),
        wres=w(ks[4], (layers, r, r), r),         bres=jnp.zeros((layers, 1, r), jnp.float32),
        wskip=w(ks[5], (layers, r, r), r),        bskip=jnp.zeros((layers, 1, r), jnp.float32),
        wo1=w(ks[6], (r, r), r),                  bo1=jnp.zeros((1, r), jnp.float32),
        wo2=w(ks[7], (r, m), r),                  bo2=jnp.zeros((1, m), jnp.float32),
        w_mlp1=w(ks[8], (r, 4 * r), r),           b_mlp1=jnp.zeros((4 * r,), jnp.float32),
        w_mlp2=w(ks[9], (4 * r, r), 4 * r),       b_mlp2=jnp.zeros((r,), jnp.float32),
    )


def step_embedding(t, params, r):
    # sinusoidal diffusion-step embedding + MLP (Mish), tiny -> computed as JAX glue
    half = r // 2
    freqs = jnp.exp(jnp.arange(half, dtype=jnp.float32) * (-math.log(10000.0) / (half - 1)))
    e = t.astype(jnp.float32)[:, None] * freqs[None, :]
    e = jnp.concatenate([jnp.sin(e), jnp.cos(e)], axis=-1)            # (B, R)
    h = e @ params['w_mlp1'] + params['b_mlp1']
    h = h * jnp.tanh(jax.nn.softplus(h))                              # Mish
    h = h @ params['w_mlp2'] + params['b_mlp2']                       # (B, R)
    return h[:, None, :]                                              # (B, 1, R)


def variance_diffusion_forward(params, x, y, mask, g, t, noise_key,
                               repeat_dim=64, timesteps=100, max_beta=0.06, s=0.008):
    """x:(B,Cin,T)  y:(B,1,T)  mask:(B,1,T) [1 = padded frame]  g:(B,G,T)  -- PyTorch NCL in."""
    B, Cin, T = x.shape
    M = repeat_dim * y.shape[1]
    R = params['win'].shape[1]
    L = params['wdil'].shape[0]
    f32, bf16 = jnp.float32, jnp.bfloat16

    # NCL -> NLC (kernel compute is channels-last)
    x_t = jnp.transpose(x, (0, 2, 1)).astype(f32)                     # (B, T, Cin)
    g_t = jnp.transpose(g, (0, 2, 1)).astype(f32)                     # (B, T, G)
    y_t = jnp.transpose(y, (0, 2, 1)).astype(f32)                     # (B, T, 1)  (no 64x tile)
    # DiffusionWrapper passes ~mask as the nonpadding mask (mask == 1 on padded frames)
    nonpad = (1.0 - jnp.transpose(mask, (0, 2, 1))).astype(f32)       # (B, T, 1)

    noise = jax.random.normal(noise_key, (B, T, M), f32)

    sqrt_acp, sqrt_om_acp = cosine_noise_schedule(timesteps, max_beta, s)
    sched = jnp.stack([sqrt_acp[t], sqrt_om_acp[t]], axis=-1)[:, None, :].astype(f32)  # (B,1,2)
    emb = step_embedding(t, params, R).astype(f32)                    # (B, 1, R)

    # Fuse the conditioner matmul into the dilated matmul along K; cast matmul weights to bf16.
    wfuse = jnp.concatenate([params['wdil'], params['wcnd']], axis=1).astype(bf16)  # (L,R+Cin,2R)
    bfuse = (params['bdil'] + params['bcnd']).astype(f32)                            # (L, 1, 2R)
    wres, bres = params['wres'].astype(bf16), params['bres'].astype(f32)
    wskip, bskip = params['wskip'].astype(bf16), params['bskip'].astype(f32)
    wc, bc = params['wc'].astype(bf16), params['bc'].astype(f32)
    win, bin_ = params['win'].astype(bf16), params['bin'].astype(f32)
    wo1, bo1 = params['wo1'].astype(bf16), params['bo1'].astype(f32)
    wo2, bo2 = params['wo2'].astype(bf16), params['bo2'].astype(f32)

    def per_batch(arr):
        nd = arr.ndim
        return pl.BlockSpec((1,) + tuple(arr.shape[1:]),
                            lambda b, l, _nd=nd: (b,) + (0,) * (_nd - 1))

    def resident(arr):                       # constant block index -> never re-DMA'd
        nd = arr.ndim
        return pl.BlockSpec(tuple(arr.shape), lambda b, l, _nd=nd: (0,) * _nd)

    def per_layer(arr):                      # streamed: one layer's weights per grid step
        nd = arr.ndim
        return pl.BlockSpec((1,) + tuple(arr.shape[1:]),
                            lambda b, l, _nd=nd: (l,) + (0,) * (_nd - 1))

    act_args = [x_t, g_t, y_t, noise, nonpad, emb, sched]
    res_args = [wc, bc, win, bin_, wo1, bo1, wo2, bo2]
    lay_args = [wfuse, bfuse, wres, bres, wskip, bskip]

    in_specs = ([per_batch(a) for a in act_args]
                + [resident(a) for a in res_args]
                + [per_layer(a) for a in lay_args])
    out_spec = pl.BlockSpec((1, 1, 1), lambda b, l: (b, 0, 0))

    scratch_shapes = [
        pltpu.VMEM((T, R), f32),             # h (residual state)
        pltpu.VMEM((T, R), f32),             # skip accumulator
        pltpu.VMEM((T, R + Cin), bf16),      # fused matmul input slab [h+emb | cond]
    ]

    # Size the scoped-VMEM limit to the real working set (double-buffered blocks + scratch),
    # clamped to stay inside every generation's physical VMEM.
    def _nbytes(a):
        return int(np.prod(a.shape)) * a.dtype.itemsize
    block_bytes = (sum(_nbytes(a) // B for a in act_args)
                   + sum(_nbytes(a) for a in res_args)
                   + sum(_nbytes(a) // L for a in lay_args))
    scratch_bytes = 2 * T * R * 4 + T * (R + Cin) * 2
    vmem_need = 2 * (block_bytes + 4) + scratch_bytes
    vmem_limit = int(min(max(2 * vmem_need, 32 * 1024 * 1024), 48 * 1024 * 1024))

    per_batch_sums = pl.pallas_call(
        functools.partial(_variance_diffusion_kernel, num_layers=L),
        out_shape=jax.ShapeDtypeStruct((B, 1, 1), f32),
        grid=(B, L),
        in_specs=in_specs,
        out_specs=out_spec,
        scratch_shapes=scratch_shapes,
        compiler_params=pltpu.CompilerParams(
            dimension_semantics=("parallel", "arbitrary"),
            vmem_limit_bytes=vmem_limit),
    )(*act_args, *res_args, *lay_args)

    # masked L1 noise loss, normalized by the number of valid (nonpadding) elements
    denom = jnp.maximum(jnp.sum(nonpad) * M, 1.0)
    return jnp.sum(per_batch_sums) / denom


# ----------------------------- demo -----------------------------

if __name__ == "__main__":
    B, T = 2, 16
    gin_channels = 32
    in_channels = 32
    repeat_dim = 64
    residual_channels = 128   # constructor arg (default 512, small for demo)
    residual_layers = 4       # constructor arg (default 20, small for demo)
    timesteps = 100

    key = jax.random.PRNGKey(0)
    k_p, k_x, k_y, k_g, k_t, k_n = jax.random.split(key, 6)

    params = init_params(k_p, gin_channels, in_channels,
                         repeat_dim, residual_channels, residual_layers)

    x = jax.random.normal(k_x, (B, in_channels, T), jnp.float32)    # encoder output (NCL)
    y = jax.random.normal(k_y, (B, 1, T), jnp.float32)              # variance target (NCL)
    g = jax.random.normal(k_g, (B, gin_channels, T), jnp.float32)   # speaker cond (NCL)
    lens = jnp.array([12, 16], jnp.int32)
    # PyTorch convention (DiffusionWrapper.forward passes ~mask): mask == 1 on PADDED frames.
    mask = (jnp.arange(T)[None, None, :] >= lens[:, None, None]).astype(jnp.float32)  # (B,1,T)
    t = jax.random.randint(k_t, (B,), 0, timesteps)                 # diffusion timestep per batch

    loss = variance_diffusion_forward(params, x, y, mask, g, t, k_n,
                                      repeat_dim=repeat_dim, timesteps=timesteps)
    loss = jax.block_until_ready(loss)
    assert jnp.isfinite(loss), "loss is not finite"
    print("KERNEL_OK")
</pallas_src>

<mosaic_0001>
module attributes {stable_mosaic.version = 11 : i64} {
  func.func @_variance_diffusion_kernel(%arg0: i32, %arg1: i32, %arg2: memref<1x16x32xf32, #tpu.memory_space<vmem>>, %arg3: memref<1x16x32xf32, #tpu.memory_space<vmem>>, %arg4: memref<1x16x1xf32, #tpu.memory_space<vmem>>, %arg5: memref<1x16x64xf32, #tpu.memory_space<vmem>>, %arg6: memref<1x16x1xf32, #tpu.memory_space<vmem>>, %arg7: memref<1x1x128xf32, #tpu.memory_space<vmem>>, %arg8: memref<1x1x2xf32, #tpu.memory_space<vmem>>, %arg9: memref<32x32xbf16, #tpu.memory_space<vmem>>, %arg10: memref<1x32xf32, #tpu.memory_space<vmem>>, %arg11: memref<64x128xbf16, #tpu.memory_space<vmem>>, %arg12: memref<1x128xf32, #tpu.memory_space<vmem>>, %arg13: memref<128x128xbf16, #tpu.memory_space<vmem>>, %arg14: memref<1x128xf32, #tpu.memory_space<vmem>>, %arg15: memref<128x64xbf16, #tpu.memory_space<vmem>>, %arg16: memref<1x64xf32, #tpu.memory_space<vmem>>, %arg17: memref<1x160x256xbf16, #tpu.memory_space<vmem>>, %arg18: memref<1x1x256xf32, #tpu.memory_space<vmem>>, %arg19: memref<1x128x128xbf16, #tpu.memory_space<vmem>>, %arg20: memref<1x1x128xf32, #tpu.memory_space<vmem>>, %arg21: memref<1x128x128xbf16, #tpu.memory_space<vmem>>, %arg22: memref<1x1x128xf32, #tpu.memory_space<vmem>>, %arg23: memref<1x1x1xf32, #tpu.memory_space<vmem>>, %arg24: memref<16x128xf32, #tpu.memory_space<vmem>>, %arg25: memref<16x128xf32, #tpu.memory_space<vmem>>, %arg26: memref<16x160xbf16, #tpu.memory_space<vmem>>) attributes {dimension_semantics = [#tpu.dimension_semantics<parallel>, #tpu.dimension_semantics<arbitrary>], iteration_bounds = array<i64: 2, 4>, scalar_prefetch = 0 : i64, scratch_operands = 3 : i64, tpu.core_type = #tpu.core_type<tc>, window_params = [{transform_indices = @transform_0, window_bounds = array<i64: 1, 16, 32>}, {transform_indices = @transform_1, window_bounds = array<i64: 1, 16, 32>}, {transform_indices = @transform_2, window_bounds = array<i64: 1, 16, 1>}, {transform_indices = @transform_3, window_bounds = array<i64: 1, 16, 64>}, {transform_indices = @transform_4, window_bounds = array<i64: 1, 16, 1>}, {transform_indices = @transform_5, window_bounds = array<i64: 1, 1, 128>}, {transform_indices = @transform_6, window_bounds = array<i64: 1, 1, 2>}, {pipeline_mode = #tpu.pipeline_mode<synchronous>, transform_indices = @transform_7, window_bounds = array<i64: 32, 32>}, {pipeline_mode = #tpu.pipeline_mode<synchronous>, transform_indices = @transform_8, window_bounds = array<i64: 1, 32>}, {pipeline_mode = #tpu.pipeline_mode<synchronous>, transform_indices = @transform_9, window_bounds = array<i64: 64, 128>}, {pipeline_mode = #tpu.pipeline_mode<synchronous>, transform_indices = @transform_10, window_bounds = array<i64: 1, 128>}, {pipeline_mode = #tpu.pipeline_mode<synchronous>, transform_indices = @transform_11, window_bounds = array<i64: 128, 128>}, {pipeline_mode = #tpu.pipeline_mode<synchronous>, transform_indices = @transform_12, window_bounds = array<i64: 1, 128>}, {pipeline_mode = #tpu.pipeline_mode<synchronous>, transform_indices = @transform_13, window_bounds = array<i64: 128, 64>}, {pipeline_mode = #tpu.pipeline_mode<synchronous>, transform_indices = @transform_14, window_bounds = array<i64: 1, 64>}, {transform_indices = @transform_15, window_bounds = array<i64: 1, 160, 256>}, {transform_indices = @transform_16, window_bounds = array<i64: 1, 1, 256>}, {transform_indices = @transform_17, window_bounds = array<i64: 1, 128, 128>}, {transform_indices = @transform_18, window_bounds = array<i64: 1, 1, 128>}, {transform_indices = @transform_19, window_bounds = array<i64: 1, 128, 128>}, {transform_indices = @transform_20, window_bounds = array<i64: 1, 1, 128>}, {transform_indices = @transform_21, window_bounds = array<i64: 1, 1, 1>}]} {
    %c0_i32 = arith.constant 0 : i32
    %0 = arith.cmpi eq, %arg1, %c0_i32 : i32
    %1 = arith.extui %0 : i1 to i32
    %c0_i32_0 = arith.constant 0 : i32
    %2 = arith.cmpi ne, %1, %c0_i32_0 : i32
    scf.if %2 {
      %c0_40 = arith.constant 0 : index
      %c0_41 = arith.constant 0 : index
      %c0_42 = arith.constant 0 : index
      %53 = vector.load %arg2[%c0_40, %c0_41, %c0_42] : memref<1x16x32xf32, #tpu.memory_space<vmem>>, vector<1x16x32xf32>
      %54 = vector.shape_cast %53 : vector<1x16x32xf32> to vector<16x32xf32>
      %c0_43 = arith.constant 0 : index
      %c0_44 = arith.constant 0 : index
      %c0_45 = arith.constant 0 : index
      %55 = vector.load %arg3[%c0_43, %c0_44, %c0_45] : memref<1x16x32xf32, #tpu.memory_space<vmem>>, vector<1x16x32xf32>
      %56 = vector.shape_cast %55 : vector<1x16x32xf32> to vector<16x32xf32>
      %57 = arith.truncf %56 : vector<16x32xf32> to vector<16x32xbf16>
      %c0_46 = arith.constant 0 : index
      %c0_47 = arith.constant 0 : index
      %58 = vector.load %arg9[%c0_46, %c0_47] : memref<32x32xbf16, #tpu.memory_space<vmem>>, vector<32x32xbf16>
      %cst_48 = arith.constant dense<0.000000e+00> : vector<16x32xf32>
      %59 = tpu.matmul %57, %58, %cst_48 {dimension_numbers = #tpu.dot_dimension_numbers<[1], [0], [0], [1], [0, 0, 1, 1], [], []>} : vector<16x32xbf16>, vector<32x32xbf16>, vector<16x32xf32> -> vector<16x32xf32>
      %60 = arith.addf %54, %59 : vector<16x32xf32>
      %c0_49 = arith.constant 0 : index
      %c0_50 = arith.constant 0 : index
      %61 = vector.load %arg10[%c0_49, %c0_50] : memref<1x32xf32, #tpu.memory_space<vmem>>, vector<1x32xf32>
      %62 = vector.broadcast %61 : vector<1x32xf32> to vector<16x32xf32>
      %63 = arith.addf %60, %62 : vector<16x32xf32>
      %c0_51 = arith.constant 0 : index
      %c0_52 = arith.constant 0 : index
      %c0_53 = arith.constant 0 : index
      %64 = vector.load %arg8[%c0_51, %c0_52, %c0_53] : memref<1x1x2xf32, #tpu.memory_space<vmem>>, vector<1x1x1xf32>
      %65 = vector.shape_cast %64 : vector<1x1x1xf32> to vector<1x1xf32>
      %c0_54 = arith.constant 0 : index
      %c0_55 = arith.constant 0 : index
      %c1 = arith.constant 1 : index
      %66 = vector.load %arg8[%c0_54, %c0_55, %c1] : memref<1x1x2xf32, #tpu.memory_space<vmem>>, vector<1x1x1xf32>
      %67 = vector.shape_cast %66 : vector<1x1x1xf32> to vector<1x1xf32>
      %c0_56 = arith.constant 0 : index
      %c0_57 = arith.constant 0 : index
      %c0_58 = arith.constant 0 : index
      %68 = vector.load %arg4[%c0_56, %c0_57, %c0_58] : memref<1x16x1xf32, #tpu.memory_space<vmem>>, vector<1x16x1xf32>
      %69 = vector.shape_cast %68 : vector<1x16x1xf32> to vector<16x1xf32>
      %70 = vector.broadcast %65 : vector<1x1xf32> to vector<16x1xf32>
      %71 = arith.mulf %70, %69 : vector<16x1xf32>
      %c0_59 = arith.constant 0 : index
      %c0_60 = arith.constant 0 : index
      %c0_61 = arith.constant 0 : index
      %72 = vector.load %arg5[%c0_59, %c0_60, %c0_61] : memref<1x16x64xf32, #tpu.memory_space<vmem>>, vector<1x16x64xf32>
      %73 = vector.shape_cast %72 : vector<1x16x64xf32> to vector<16x64xf32>
      %74 = vector.broadcast %67 : vector<1x1xf32> to vector<16x64xf32>
      %75 = arith.mulf %74, %73 : vector<16x64xf32>
      %76 = vector.broadcast %71 : vector<16x1xf32> to vector<16x64xf32>
      %77 = arith.addf %76, %75 : vector<16x64xf32>
      %78 = arith.truncf %77 : vector<16x64xf32> to vector<16x64xbf16>
      %c0_62 = arith.constant 0 : index
      %c0_63 = arith.constant 0 : index
      %79 = vector.load %arg11[%c0_62, %c0_63] : memref<64x128xbf16, #tpu.memory_space<vmem>>, vector<64x128xbf16>
      %cst_64 = arith.constant dense<0.000000e+00> : vector<16x128xf32>
      %80 = tpu.matmul %78, %79, %cst_64 {dimension_numbers = #tpu.dot_dimension_numbers<[1], [0], [0], [1], [0, 0, 1, 1], [], []>} : vector<16x64xbf16>, vector<64x128xbf16>, vector<16x128xf32> -> vector<16x128xf32>
      %c0_65 = arith.constant 0 : index
      %c0_66 = arith.constant 0 : index
      %81 = vector.load %arg12[%c0_65, %c0_66] : memref<1x128xf32, #tpu.memory_space<vmem>>, vector<1x128xf32>
      %82 = vector.broadcast %81 : vector<1x128xf32> to vector<16x128xf32>
      %83 = arith.addf %80, %82 : vector<16x128xf32>
      %cst_67 = arith.constant 0.000000e+00 : f32
      %84 = vector.broadcast %cst_67 : f32 to vector<16x128xf32>
      %85 = arith.maximumf %83, %84 : vector<16x128xf32>
      %c0_68 = arith.constant 0 : index
      %c0_69 = arith.constant 0 : index
      %86 = vector.load %arg24[%c0_68, %c0_69] : memref<16x128xf32, #tpu.memory_space<vmem>>, vector<16x128xf32>
      tpu.vector_store %arg24[%c0_68, %c0_69], %85 {strides = array<i32>} : memref<16x128xf32, #tpu.memory_space<vmem>>, vector<16x128xf32>,
      %cst_70 = arith.constant 0.000000e+00 : f32
      %87 = vector.broadcast %cst_70 : f32 to vector<16x128xf32>
      %c0_71 = arith.constant 0 : index
      %c0_72 = arith.constant 0 : index
      %88 = vector.load %arg25[%c0_71, %c0_72] : memref<16x128xf32, #tpu.memory_space<vmem>>, vector<16x128xf32>
      tpu.vector_store %arg25[%c0_71, %c0_72], %87 {strides = array<i32>} : memref<16x128xf32, #tpu.memory_space<vmem>>, vector<16x128xf32>,
      %89 = arith.truncf %63 : vector<16x32xf32> to vector<16x32xbf16>
      %c0_73 = arith.constant 0 : index
      %c128 = arith.constant 128 : index
      %90 = vector.load %arg26[%c0_73, %c128] : memref<16x160xbf16, #tpu.memory_space<vmem>>, vector<16x32xbf16>
      tpu.vector_store %arg26[%c0_73, %c128], %89 {strides = array<i32>} : memref<16x160xbf16, #tpu.memory_space<vmem>>, vector<16x32xbf16>,
    } else {
    }
    %c0 = arith.constant 0 : index
    %c0_1 = arith.constant 0 : index
    %3 = vector.load %arg24[%c0, %c0_1] : memref<16x128xf32, #tpu.memory_space<vmem>>, vector<16x128xf32>
    %c0_2 = arith.constant 0 : index
    %c0_3 = arith.constant 0 : index
    %c0_4 = arith.constant 0 : index
    %4 = vector.load %arg7[%c0_2, %c0_3, %c0_4] : memref<1x1x128xf32, #tpu.memory_space<vmem>>, vector<1x1x128xf32>
    %5 = vector.shape_cast %4 : vector<1x1x128xf32> to vector<1x128xf32>
    %6 = vector.broadcast %5 : vector<1x128xf32> to vector<16x128xf32>
    %7 = arith.addf %3, %6 : vector<16x128xf32>
    %8 = arith.truncf %7 : vector<16x128xf32> to vector<16x128xbf16>
    %c0_5 = arith.constant 0 : index
    %c0_6 = arith.constant 0 : index
    %9 = vector.load %arg26[%c0_5, %c0_6] : memref<16x160xbf16, #tpu.memory_space<vmem>>, vector<16x128xbf16>
    tpu.vector_store %arg26[%c0_5, %c0_6], %8 {strides = array<i32>} : memref<16x160xbf16, #tpu.memory_space<vmem>>, vector<16x128xbf16>,
    %c0_7 = arith.constant 0 : index
    %c0_8 = arith.constant 0 : index
    %10 = vector.load %arg26[%c0_7, %c0_8] : memref<16x160xbf16, #tpu.memory_space<vmem>>, vector<16x160xbf16>
    %c0_9 = arith.constant 0 : index
    %c0_10 = arith.constant 0 : index
    %c0_11 = arith.constant 0 : index
    %11 = vector.load %arg17[%c0_9, %c0_10, %c0_11] : memref<1x160x256xbf16, #tpu.memory_space<vmem>>, vector<1x160x256xbf16>
    %12 = vector.shape_cast %11 : vector<1x160x256xbf16> to vector<160x256xbf16>
    %cst = arith.constant dense<0.000000e+00> : vector<16x256xf32>
    %13 = tpu.matmul %10, %12, %cst {dimension_numbers = #tpu.dot_dimension_numbers<[1], [0], [0], [1], [0, 0, 1, 1], [], []>} : vector<16x160xbf16>, vector<160x256xbf16>, vector<16x256xf32> -> vector<16x256xf32>
    %c0_12 = arith.constant 0 : index
    %c0_13 = arith.constant 0 : index
    %c0_14 = arith.constant 0 : index
    %14 = vector.load %arg18[%c0_12, %c0_13, %c0_14] : memref<1x1x256xf32, #tpu.memory_space<vmem>>, vector<1x1x256xf32>
    %15 = vector.shape_cast %14 : vector<1x1x256xf32> to vector<1x256xf32>
    %16 = vector.broadcast %15 : vector<1x256xf32> to vector<16x256xf32>
    %17 = arith.addf %13, %16 : vector<16x256xf32>
    %18 = vector.extract_strided_slice %17 {offsets = [0, 0], sizes = [16, 128], strides = [1, 1]} : vector<16x256xf32> to vector<16x128xf32>
    %19 = arith.negf %18 : vector<16x128xf32>
    %20 = math.exp %19 : vector<16x128xf32>
    %cst_15 = arith.constant 1.000000e+00 : f32
    %21 = vector.broadcast %cst_15 : f32 to vector<16x128xf32>
    %22 = arith.addf %21, %20 : vector<16x128xf32>
    %23 = arith.divf %21, %22 : vector<16x128xf32>
    %24 = vector.extract_strided_slice %17 {offsets = [0, 128], sizes = [16, 128], strides = [1, 1]} : vector<16x256xf32> to vector<16x128xf32>
    %25 = math.tanh %24 : vector<16x128xf32>
    %26 = arith.mulf %23, %25 : vector<16x128xf32>
    %27 = arith.truncf %26 : vector<16x128xf32> to vector<16x128xbf16>
    %c0_16 = arith.constant 0 : index
    %c0_17 = arith.constant 0 : index
    %28 = vector.load %arg24[%c0_16, %c0_17] : memref<16x128xf32, #tpu.memory_space<vmem>>, vector<16x128xf32>
    %c0_18 = arith.constant 0 : index
    %c0_19 = arith.constant 0 : index
    %c0_20 = arith.constant 0 : index
    %29 = vector.load %arg19[%c0_18, %c0_19, %c0_20] : memref<1x128x128xbf16, #tpu.memory_space<vmem>>, vector<1x128x128xbf16>
    %30 = vector.shape_cast %29 : vector<1x128x128xbf16> to vector<128x128xbf16>
    %cst_21 = arith.constant dense<0.000000e+00> : vector<16x128xf32>
    %31 = tpu.matmul %27, %30, %cst_21 {dimension_numbers = #tpu.dot_dimension_numbers<[1], [0], [0], [1], [0, 0, 1, 1], [], []>} : vector<16x128xbf16>, vector<128x128xbf16>, vector<16x128xf32> -> vector<16x128xf32>
    %32 = arith.addf %28, %31 : vector<16x128xf32>
    %c0_22 = arith.constant 0 : index
    %c0_23 = arith.constant 0 : index
    %c0_24 = arith.constant 0 : index
    %33 = vector.load %arg20[%c0_22, %c0_23, %c0_24] : memref<1x1x128xf32, #tpu.memory_space<vmem>>, vector<1x1x128xf32>
    %34 = vector.shape_cast %33 : vector<1x1x128xf32> to vector<1x128xf32>
    %35 = vector.broadcast %34 : vector<1x128xf32> to vector<16x128xf32>
    %36 = arith.addf %32, %35 : vector<16x128xf32>
    %cst_25 = arith.constant 0.707106769 : f32
    %37 = vector.broadcast %cst_25 : f32 to vector<16x128xf32>
    %38 = arith.mulf %36, %37 : vector<16x128xf32>
    %c0_26 = arith.constant 0 : index
    %c0_27 = arith.constant 0 : index
    %39 = vector.load %arg24[%c0_26, %c0_27] : memref<16x128xf32, #tpu.memory_space<vmem>>, vector<16x128xf32>
    tpu.vector_store %arg24[%c0_26, %c0_27], %38 {strides = array<i32>} : memref<16x128xf32, #tpu.memory_space<vmem>>, vector<16x128xf32>,
    %c0_28 = arith.constant 0 : index
    %c0_29 = arith.constant 0 : index
    %40 = vector.load %arg25[%c0_28, %c0_29] : memref<16x128xf32, #tpu.memory_space<vmem>>, vector<16x128xf32>
    %c0_30 = arith.constant 0 : index
    %c0_31 = arith.constant 0 : index
    %c0_32 = arith.constant 0 : index
    %41 = vector.load %arg21[%c0_30, %c0_31, %c0_32] : memref<1x128x128xbf16, #tpu.memory_space<vmem>>, vector<1x128x128xbf16>
    %42 = vector.shape_cast %41 : vector<1x128x128xbf16> to vector<128x128xbf16>
    %cst_33 = arith.constant dense<0.000000e+00> : vector<16x128xf32>
    %43 = tpu.matmul %27, %42, %cst_33 {dimension_numbers = #tpu.dot_dimension_numbers<[1], [0], [0], [1], [0, 0, 1, 1], [], []>} : vector<16x128xbf16>, vector<128x128xbf16>, vector<16x128xf32> -> vector<16x128xf32>
    %44 = arith.addf %40, %43 : vector<16x128xf32>
    %c0_34 = arith.constant 0 : index
    %c0_35 = arith.constant 0 : index
    %c0_36 = arith.constant 0 : index
    %45 = vector.load %arg22[%c0_34, %c0_35, %c0_36] : memref<1x1x128xf32, #tpu.memory_space<vmem>>, vector<1x1x128xf32>
    %46 = vector.shape_cast %45 : vector<1x1x128xf32> to vector<1x128xf32>
    %47 = vector.broadcast %46 : vector<1x128xf32> to vector<16x128xf32>
    %48 = arith.addf %44, %47 : vector<16x128xf32>
    %c0_37 = arith.constant 0 : index
    %c0_38 = arith.constant 0 : index
    %49 = vector.load %arg25[%c0_37, %c0_38] : memref<16x128xf32, #tpu.memory_space<vmem>>, vector<16x128xf32>
    tpu.vector_store %arg25[%c0_37, %c0_38], %48 {strides = array<i32>} : memref<16x128xf32, #tpu.memory_space<vmem>>, vector<16x128xf32>,
    %c3_i32 = arith.constant 3 : i32
    %50 = arith.cmpi eq, %arg1, %c3_i32 : i32
    %51 = arith.extui %50 : i1 to i32
    %c0_i32_39 = arith.constant 0 : i32
    %52 = arith.cmpi ne, %51, %c0_i32_39 : i32
    scf.if %52 {
      %c0_40 = arith.constant 0 : index
      %c0_41 = arith.constant 0 : index
      %53 = vector.load %arg25[%c0_40, %c0_41] : memref<16x128xf32, #tpu.memory_space<vmem>>, vector<16x128xf32>
      %cst_42 = arith.constant 5.000000e-01 : f32
      %54 = vector.broadcast %cst_42 : f32 to vector<16x128xf32>
      %55 = arith.mulf %53, %54 : vector<16x128xf32>
      %56 = arith.truncf %55 : vector<16x128xf32> to vector<16x128xbf16>
      %c0_43 = arith.constant 0 : index
      %c0_44 = arith.constant 0 : index
      %57 = vector.load %arg13[%c0_43, %c0_44] : memref<128x128xbf16, #tpu.memory_space<vmem>>, vector<128x128xbf16>
      %cst_45 = arith.constant dense<0.000000e+00> : vector<16x128xf32>
      %58 = tpu.matmul %56, %57, %cst_45 {dimension_numbers = #tpu.dot_dimension_numbers<[1], [0], [0], [1], [0, 0, 1, 1], [], []>} : vector<16x128xbf16>, vector<128x128xbf16>, vector<16x128xf32> -> vector<16x128xf32>
      %c0_46 = arith.constant 0 : index
      %c0_47 = arith.constant 0 : index
      %59 = vector.load %arg14[%c0_46, %c0_47] : memref<1x128xf32, #tpu.memory_space<vmem>>, vector<1x128xf32>
      %60 = vector.broadcast %59 : vector<1x128xf32> to vector<16x128xf32>
      %61 = arith.addf %58, %60 : vector<16x128xf32>
      %cst_48 = arith.constant 0.000000e+00 : f32
      %62 = vector.broadcast %cst_48 : f32 to vector<16x128xf32>
      %63 = arith.maximumf %61, %62 : vector<16x128xf32>
      %64 = arith.truncf %63 : vector<16x128xf32> to vector<16x128xbf16>
      %c0_49 = arith.constant 0 : index
      %c0_50 = arith.constant 0 : index
      %65 = vector.load %arg15[%c0_49, %c0_50] : memref<128x64xbf16, #tpu.memory_space<vmem>>, vector<128x64xbf16>
      %cst_51 = arith.constant dense<0.000000e+00> : vector<16x64xf32>
      %66 = tpu.matmul %64, %65, %cst_51 {dimension_numbers = #tpu.dot_dimension_numbers<[1], [0], [0], [1], [0, 0, 1, 1], [], []>} : vector<16x128xbf16>, vector<128x64xbf16>, vector<16x64xf32> -> vector<16x64xf32>
      %c0_52 = arith.constant 0 : index
      %c0_53 = arith.constant 0 : index
      %67 = vector.load %arg16[%c0_52, %c0_53] : memref<1x64xf32, #tpu.memory_space<vmem>>, vector<1x64xf32>
      %68 = vector.broadcast %67 : vector<1x64xf32> to vector<16x64xf32>
      %69 = arith.addf %66, %68 : vector<16x64xf32>
      %c0_54 = arith.constant 0 : index
      %c0_55 = arith.constant 0 : index
      %c0_56 = arith.constant 0 : index
      %70 = vector.load %arg5[%c0_54, %c0_55, %c0_56] : memref<1x16x64xf32, #tpu.memory_space<vmem>>, vector<1x16x64xf32>
      %71 = vector.shape_cast %70 : vector<1x16x64xf32> to vector<16x64xf32>
      %72 = arith.subf %71, %69 : vector<16x64xf32>
      %73 = math.absf %72 : vector<16x64xf32>
      %c0_57 = arith.constant 0 : index
      %c0_58 = arith.constant 0 : index
      %c0_59 = arith.constant 0 : index
      %74 = vector.load %arg6[%c0_57, %c0_58, %c0_59] : memref<1x16x1xf32, #tpu.memory_space<vmem>>, vector<1x16x1xf32>
      %75 = vector.shape_cast %74 : vector<1x16x1xf32> to vector<16x1xf32>
      %76 = vector.broadcast %75 : vector<16x1xf32> to vector<16x64xf32>
      %77 = arith.mulf %73, %76 : vector<16x64xf32>
      %78 = vector.shape_cast %77 : vector<16x64xf32> to vector<1x16x64xf32>
      %cst_60 = arith.constant dense<0.000000e+00> : vector<1xf32>
      %79 = vector.multi_reduction <add>, %78, %cst_60 [1, 2] : vector<1x16x64xf32> to vector<1xf32>
      %80 = vector.shape_cast %79 : vector<1xf32> to vector<1x1x1xf32>
      %81 = vector.extract %80[0, 0, 0] : f32 from vector<1x1x1xf32>
      %82 = vector.broadcast %81 : f32 to vector<1x1x1xf32>
      %c0_61 = arith.constant 0 : index
      %c0_62 = arith.constant 0 : index
      %c0_63 = arith.constant 0 : index
      %83 = vector.load %arg23[%c0_61, %c0_62, %c0_63] : memref<1x1x1xf32, #tpu.memory_space<vmem>>, vector<1x1x1xf32>
      tpu.vector_store %arg23[%c0_61, %c0_62, %c0_63], %82 {strides = array<i32>} : memref<1x1x1xf32, #tpu.memory_space<vmem>>, vector<1x1x1xf32>,
    } else {
    }
    return
  }
  func.func @transform_0(%arg0: i32, %arg1: i32) -> (i32, i32, i32) {
    %c0_i32 = arith.constant 0 : i32
    %c0_i32_0 = arith.constant 0 : i32
    %c0_i32_1 = arith.constant 0 : i32
    return %arg0, %c0_i32, %c0_i32_0 : i32, i32, i32
  }
  func.func @transform_1(%arg0: i32, %arg1: i32) -> (i32, i32, i32) {
    %c0_i32 = arith.constant 0 : i32
    %c0_i32_0 = arith.constant 0 : i32
    %c0_i32_1 = arith.constant 0 : i32
    return %arg0, %c0_i32, %c0_i32_0 : i32, i32, i32
  }
  func.func @transform_2(%arg0: i32, %arg1: i32) -> (i32, i32, i32) {
    %c0_i32 = arith.constant 0 : i32
    %c0_i32_0 = arith.constant 0 : i32
    %c0_i32_1 = arith.constant 0 : i32
    return %arg0, %c0_i32, %c0_i32_0 : i32, i32, i32
  }
  func.func @transform_3(%arg0: i32, %arg1: i32) -> (i32, i32, i32) {
    %c0_i32 = arith.constant 0 : i32
    %c0_i32_0 = arith.constant 0 : i32
    %c0_i32_1 = arith.constant 0 : i32
    return %arg0, %c0_i32, %c0_i32_0 : i32, i32, i32
  }
  func.func @transform_4(%arg0: i32, %arg1: i32) -> (i32, i32, i32) {
    %c0_i32 = arith.constant 0 : i32
    %c0_i32_0 = arith.constant 0 : i32
    %c0_i32_1 = arith.constant 0 : i32
    return %arg0, %c0_i32, %c0_i32_0 : i32, i32, i32
  }
  func.func @transform_5(%arg0: i32, %arg1: i32) -> (i32, i32, i32) {
    %c0_i32 = arith.constant 0 : i32
    %c0_i32_0 = arith.constant 0 : i32
    %c0_i32_1 = arith.constant 0 : i32
    return %arg0, %c0_i32, %c0_i32_0 : i32, i32, i32
  }
  func.func @transform_6(%arg0: i32, %arg1: i32) -> (i32, i32, i32) {
    %c0_i32 = arith.constant 0 : i32
    %c0_i32_0 = arith.constant 0 : i32
    %c0_i32_1 = arith.constant 0 : i32
    return %arg0, %c0_i32, %c0_i32_0 : i32, i32, i32
  }
  func.func @transform_7(%arg0: i32, %arg1: i32) -> (i32, i32) {
    %c0_i32 = arith.constant 0 : i32
    %c0_i32_0 = arith.constant 0 : i32
    %c0_i32_1 = arith.constant 0 : i32
    return %c0_i32, %c0_i32_0 : i32, i32
  }
  func.func @transform_8(%arg0: i32, %arg1: i32) -> (i32, i32) {
    %c0_i32 = arith.constant 0 : i32
    %c0_i32_0 = arith.constant 0 : i32
    %c0_i32_1 = arith.constant 0 : i32
    return %c0_i32, %c0_i32_0 : i32, i32
  }
  func.func @transform_9(%arg0: i32, %arg1: i32) -> (i32, i32) {
    %c0_i32 = arith.constant 0 : i32
    %c0_i32_0 = arith.constant 0 : i32
    %c0_i32_1 = arith.constant 0 : i32
    return %c0_i32, %c0_i32_0 : i32, i32
  }
  func.func @transform_10(%arg0: i32, %arg1: i32) -> (i32, i32) {
    %c0_i32 = arith.constant 0 : i32
    %c0_i32_0 = arith.constant 0 : i32
    %c0_i32_1 = arith.constant 0 : i32
    return %c0_i32, %c0_i32_0 : i32, i32
  }
  func.func @transform_11(%arg0: i32, %arg1: i32) -> (i32, i32) {
    %c0_i32 = arith.constant 0 : i32
    %c0_i32_0 = arith.constant 0 : i32
    %c0_i32_1 = arith.constant 0 : i32
    return %c0_i32, %c0_i32_0 : i32, i32
  }
  func.func @transform_12(%arg0: i32, %arg1: i32) -> (i32, i32) {
    %c0_i32 = arith.constant 0 : i32
    %c0_i32_0 = arith.constant 0 : i32
    %c0_i32_1 = arith.constant 0 : i32
    return %c0_i32, %c0_i32_0 : i32, i32
  }
  func.func @transform_13(%arg0: i32, %arg1: i32) -> (i32, i32) {
    %c0_i32 = arith.constant 0 : i32
    %c0_i32_0 = arith.constant 0 : i32
    %c0_i32_1 = arith.constant 0 : i32
    return %c0_i32, %c0_i32_0 : i32, i32
  }
  func.func @transform_14(%arg0: i32, %arg1: i32) -> (i32, i32) {
    %c0_i32 = arith.constant 0 : i32
    %c0_i32_0 = arith.constant 0 : i32
    %c0_i32_1 = arith.constant 0 : i32
    return %c0_i32, %c0_i32_0 : i32, i32
  }
  func.func @transform_15(%arg0: i32, %arg1: i32) -> (i32, i32, i32) {
    %c0_i32 = arith.constant 0 : i32
    %c0_i32_0 = arith.constant 0 : i32
    %c0_i32_1 = arith.constant 0 : i32
    return %arg1, %c0_i32, %c0_i32_0 : i32, i32, i32
  }
  func.func @transform_16(%arg0: i32, %arg1: i32) -> (i32, i32, i32) {
    %c0_i32 = arith.constant 0 : i32
    %c0_i32_0 = arith.constant 0 : i32
    %c0_i32_1 = arith.constant 0 : i32
    return %arg1, %c0_i32, %c0_i32_0 : i32, i32, i32
  }
  func.func @transform_17(%arg0: i32, %arg1: i32) -> (i32, i32, i32) {
    %c0_i32 = arith.constant 0 : i32
    %c0_i32_0 = arith.constant 0 : i32
    %c0_i32_1 = arith.constant 0 : i32
    return %arg1, %c0_i32, %c0_i32_0 : i32, i32, i32
  }
  func.func @transform_18(%arg0: i32, %arg1: i32) -> (i32, i32, i32) {
    %c0_i32 = arith.constant 0 : i32
    %c0_i32_0 = arith.constant 0 : i32
    %c0_i32_1 = arith.constant 0 : i32
    return %arg1, %c0_i32, %c0_i32_0 : i32, i32, i32
  }
  func.func @transform_19(%arg0: i32, %arg1: i32) -> (i32, i32, i32) {
    %c0_i32 = arith.constant 0 : i32
    %c0_i32_0 = arith.constant 0 : i32
    %c0_i32_1 = arith.constant 0 : i32
    return %arg1, %c0_i32, %c0_i32_0 : i32, i32, i32
  }
  func.func @transform_20(%arg0: i32, %arg1: i32) -> (i32, i32, i32) {
    %c0_i32 = arith.constant 0 : i32
    %c0_i32_0 = arith.constant 0 : i32
    %c0_i32_1 = arith.constant 0 : i32
    return %arg1, %c0_i32, %c0_i32_0 : i32, i32, i32
  }
  func.func @transform_21(%arg0: i32, %arg1: i32) -> (i32, i32, i32) {
    %c0_i32 = arith.constant 0 : i32
    %c0_i32_0 = arith.constant 0 : i32
    %c0_i32_1 = arith.constant 0 : i32
    return %arg0, %c0_i32, %c0_i32_0 : i32, i32, i32
  }
}

</mosaic_0001>

<bundles_post_ra>
// kernel: tpu_custom_call.1
= control target key start
LH: loop header
LB: loop body
LE: loop exit
PB: predicated region body
PF: predicated region fallthrough
CT: control target
= control target key end

     0   :  { %s3906_s0 = inlined_call_operand.vmem [shape: f32[2,16,32], index: 0, kind: input, shape index: {}]   ;;  %s3907_s1 = inlined_call_operand.vmem [shape: f32[2,16,32], index: 1, kind: input, shape index: {}]   ;;  %s3908_s2 = inlined_call_operand.vmem [shape: f32[2,16,1], index: 2, kind: input, shape index: {}]   ;;  %s3909_s3 = inlined_call_operand.hbm [shape: f32[2,16,64], index: 3, kind: input, shape index: {}]   ;;  %s3910_s4 = inlined_call_operand.vmem [shape: f32[2,16,1], index: 4, kind: input, shape index: {}]   ;;  %s3911_s5 = inlined_call_operand.hbm [shape: f32[2,1,128], index: 5, kind: input, shape index: {}]   ;;  %s3912_s6 = inlined_call_operand.hbm [shape: f32[2,1,2], index: 6, kind: input, shape index: {}]   ;;  %s3913_s7 = inlined_call_operand.vmem [shape: bf16[32,32], index: 7, kind: input, shape index: {}]   ;;  %s3914_s8 = inlined_call_operand.vmem [shape: f32[1,32], index: 8, kind: input, shape index: {}]   ;;  %s3915_s9 = inlined_call_operand.hbm [shape: bf16[64,128], index: 9, kind: input, shape index: {}]   ;;  %s3916_s10 = inlined_call_operand.hbm [shape: f32[1,128], index: 10, kind: input, shape index: {}]   ;;  %s3917_s11 = inlined_call_operand.vmem [shape: bf16[128,128], index: 11, kind: input, shape index: {}]   ;;  %s3918_s12 = inlined_call_operand.hbm [shape: f32[1,128], index: 12, kind: input, shape index: {}]   ;;  %s3919_s13 = inlined_call_operand.vmem [shape: bf16[128,64], index: 13, kind: input, shape index: {}]   ;;  %s3920_s14 = inlined_call_operand.hbm [shape: f32[1,64], index: 14, kind: input, shape index: {}]   ;;  %s3921_s15 = inlined_call_operand.hbm [shape: bf16[4,160,256], index: 15, kind: input, shape index: {}]   ;;  %s3922_s16 = inlined_call_operand.vmem [shape: f32[4,1,256], index: 16, kind: input, shape index: {}]   ;;  %s3923_s17 = inlined_call_operand.hbm [shape: bf16[4,128,128], index: 17, kind: input, shape index: {}]   ;;  %s3924_s18 = inlined_call_operand.vmem [shape: f32[4,1,128], index: 18, kind: input, shape index: {}]   ;;  %s3925_s19 = inlined_call_operand.hbm [shape: bf16[4,128,128], index: 19, kind: input, shape index: {}]   ;;  %s3926_s20 = inlined_call_operand.vmem [shape: f32[4,1,128], index: 20, kind: input, shape index: {}]   ;;  %s3927_s21 = inlined_call_operand.vmem [shape: f32[2,1,1], index: 21, kind: output, shape index: {}]  }
   0x1   :  { %3966 = sst [smem:[#allocation44_spill]] %s3906_s0 }
   0x2   :  { %3967 = sst [smem:[#allocation45_spill]] %s3907_s1 }
   0x3   :  { %3968 = sst [smem:[#allocation46_spill]] %s3908_s2 }
   0x4   :  { %3969 = sst [smem:[#allocation47_spill]] %s3909_s3 }
   0x5   :  { %3970 = sst [smem:[#allocation48_spill]] %s3910_s4 }
   0x6   :  { %3971 = sst [smem:[#allocation49_spill]] %s3911_s5 }
   0x7   :  { %3972 = sst [smem:[#allocation50_spill]] %s3912_s6 }
   0x8   :  { %3973 = sst [smem:[#allocation51_spill]] %s3913_s7 }
   0x9   :  { %3974 = sst [smem:[#allocation52_spill]] %s3914_s8 }
   0xa   :  { %3975 = sst [smem:[#allocation53_spill]] %s3915_s9 }
   0xb   :  { %3976 = sst [smem:[#allocation54_spill]] %s3916_s10 }
   0xc   :  { %3977 = sst [smem:[#allocation55_spill]] %s3917_s11 }
   0xd   :  { %3978 = sst [smem:[#allocation56_spill]] %s3918_s12 }
   0xe   :  { %3979 = sst [smem:[#allocation57_spill]] %s3919_s13 }
   0xf   :  { %3980 = sst [smem:[#allocation58_spill]] %s3920_s14 }
  0x10   :  { %3981 = sst [smem:[#allocation59_spill]] %s3921_s15 }
  0x11   :  { %3982 = sst [smem:[#allocation60_spill]] %s3922_s16 }
  0x12   :  { %3983 = sst [smem:[#allocation61_spill]] %s3923_s17 }
  0x13   :  { %3984 = sst [smem:[#allocation62_spill]] %s3924_s18 }
  0x14   :  { %3985 = sst [smem:[#allocation63_spill]] %s3925_s19 }
  0x15   :  { %3986 = sst [smem:[#allocation64_spill]] %s3926_s20 }
  0x16   :  { %3987 = sst [smem:[#allocation65_spill]] %s3927_s21 }
  0x17   :  { %26 = vsyncpa [#allocation6], 0 }
  0x18   :  { %28 = vsyncpa [#allocation6 + $0x1], 0 }
  0x19   :  { %29 = vsyncpa [#allocation8], 0 }
  0x1a   :  { %31 = vsyncpa [#allocation8 + $0x1], 0 }
  0x1b   :  { %32 = vsyncpa [#allocation11], 0 }
  0x1c   :  { %33 = vsyncpa [#allocation14], 0 }
  0x1d   :  { %34 = vsyncpa [#allocation17], 0 }
  0x1e   :  { %36 = vsyncpa [#allocation17 + $0x1], 0 }
  0x1f   :  { %37 = vsyncpa [#allocation20], 0 }
  0x20   :  { %39 = vsyncpa [#allocation20 + $0x1], 0  ;;  %s3346_s2 = smov 0   ;;  %s3348_s25 = smov 0  }
  0x21   :  { %s3350_s26 = smov 0   ;;  %s3352_s27 = smov 0  }
  0x22   :  { %s3354_s3 = smov 0   ;;  %s3356_s28 = smov 0  }
  0x23   :  { %s3358_s29 = smov 0   ;;  %s3360_s0 = smov 0  }
  0x24   :  { %s3362_s4 = smov 0   ;;  %s3364_s30 = smov 0  }
  0x25   :  { %s3366_s5 = smov 0  }
  0x26 LB: > { %3988 = sst [smem:[#allocation27_spill]] %s3175_s25  ;;  %s3930_s22 = sadd.s32 4294967295, %s3211_s5   ;;  %s3211_s5 = sphi %s3366_s5, %s45_s5   ;;  %s3207_s30 = sphi %s3364_s30, %s4084_s30   ;;  %s3203_s4 = sphi %s3362_s4, %s4083_s4   ;;  %s3199_s0 = sphi %s3360_s0, %s4082_s0   ;;  %s3195_s29 = sphi %s3358_s29, %s4081_s29   ;;  %s3191_s28 = sphi %s3356_s28, %s4080_s28   ;;  %s3187_s3 = sphi %s3354_s3, %s4079_s3   ;;  %s3183_s27 = sphi %s3352_s27, %s4078_s27   ;;  %s3179_s26 = sphi %s3350_s26, %s4077_s26   ;;  %s3175_s25 = sphi %s3348_s25, %s4076_s25   ;;  %s3171_s2 = sphi %s3346_s2, %s4075_s2  }
  0x27   : > { %3989 = sst [smem:[#allocation28_spill]] %s3179_s26  ;;  %p2292_p0 = scmp.ge.s32.totalorder %s3211_s5, 1 }
  0x28   : > { %3990 = sst [smem:[#allocation29_spill]] %s3187_s3  ;;  %p3405_p1 = scmp.eq.s32.totalorder %s3930_s22, 0 }
  0x29   : > { %3991 = sst [smem:[#allocation30_spill]] %s3191_s28  ;;  %p594_p2 = scmp.lt.s32.totalorder %s3211_s5, 9 }
  0x2a   : > { %3992 = sst [smem:[#allocation31_spill]] %s3195_s29  ;;  %s3213_s24 = smov [#allocation10]  }
  0x2b   : > { %3993 = sst [smem:[#allocation32_spill]] %s3199_s0  ;;  %p3410_p3 = pnand %p2292_p0, %p594_p2 }
  0x2c   : > { %3994 = sst [smem:[#allocation33_spill]] %s3203_s4  ;;  %s612_s13 = sshll.u32 %s3213_s24, 4  ;;  %s613_s13 = int_to_ptr.vmem [resolvable:$true] %s612_s13 }
  0x2d   : > { %3995 = sst [smem:[#allocation34_spill]] %s3207_s30  ;;  %p2596_p4 = pneg %p3410_p3 }
  0x2e   : > { %3996 = sst [smem:[#allocation35_spill]] %s3211_s5  ;;  %s3214_s22 = smov [#allocation13]  }
  0x2f   : > { %s3997_s23 = scalar_select %p3405_p1, 1, 0 }
  0x30   : > { %s3999_s1 = scalar_select %p3410_p3, 1, 0 }
  0x31   : > { %3998 = sst [smem:[#allocation36_spill]] %s3997_s23  ;;  %p3418_p5 = pnand %p2596_p4, %p3405_p1 }
  0x32   : > { %4000 = sst [smem:[#allocation37_spill]] %s3999_s1  ;;  %s640_s8 = sshll.u32 %s3214_s22, 4  ;;  %s641_s8 = int_to_ptr.vmem [resolvable:$true] %s640_s8 }
  0x33   : > { %p3943_p6 = pneg %p3418_p5  ;;  %s2840_s7 = scalar_lea.vmem %s613_s13, 512 }
  0x34   : > { %p2841_p7 = scmp.ne.s32.totalorder %s613_s13, %s2840_s7  ;;  %p2848_p10 = scmp.lt.s32.totalorder %s613_s13, %s613_s13 }
  0x35   : > { %p2849_p11 = scmp.lt.s32.totalorder %s2840_s7, %s2840_s7 }
  0x36   : > { %p2843_p8 = pnand %p2841_p7, %p3943_p6 }
  0x37   : > { %p2850_p12 = por %p2849_p11, %p2848_p10 }
  0x38   : > { %p2844_p9 = pneg %p2843_p8 }
  0x3a   : > { %p2851_p13 = pnand %p2850_p12, %p2844_p9 }
  0x3c   : > { %2854 = shalt.err (!%p2851_p13)
}
  0x3d   : > { %s3933_s24 = smov 64   ;;  %s3935_s20 = smov 4  }
  0x3e   : > { %s4002_s9 = sld [smem:[#allocation53_spill]]  ;;  %s2866_s18 = scalar_lea.vmem %s641_s8, 16 }
  0x3f   : > { %p2867_p0 = scmp.ne.s32.totalorder %s641_s8, %s2866_s18  ;;  %s2873_s7 = scalar_lea.vmem %s641_s8, 32 }
  0x40   : > { %p2874_p7 = scmp.lt.s32.totalorder %s641_s8, %s641_s8  ;;  %p2875_p8 = scmp.lt.s32.totalorder %s2873_s7, %s2866_s18 }
  0x41   : > { %p2869_p2 = pnand %p2867_p0, %p3943_p6 }
  0x42   : > { %p2876_p9 = por %p2875_p8, %p2874_p7 }
  0x43   : > { %p2870_p4 = pneg %p2869_p2 }
  0x44   : > { %2599 = dma.hbm_to_vmem [thread:$0]  (!%p3418_p5), %s4002_s9, 512, %s613_s13, [#allocation11], %s3933_s24, %s3933_s24, %s3935_s20  }
  0x45   : > { %p2877_p10 = pnand %p2876_p9, %p2870_p4 }
  0x47   : > { %2880 = shalt.err (!%p2877_p10)
}
  0x48   : > { %s4003_s12 = sld [smem:[#allocation56_spill]]  ;;  %p149_p11 = scmp.ne.s32.totalorder %s3191_s28, %s3187_s3 }
  0x49   : > { %p150_p12 = scmp.eq.s32.totalorder %s3211_s5, 0  ;;  %p155_p13 = scmp.ne.s32.totalorder %s3187_s3, %s3183_s27 }
  0x4a   : > { %p421_p2 = scmp.ne.s32.totalorder %s3179_s26, %s3175_s25  ;;  %p427_p7 = scmp.ne.s32.totalorder %s3175_s25, %s3171_s2 }
  0x4b   : > { %p151_p0 = por %p150_p12, %p149_p11  ;;  %p3455_p4 = por %p3405_p1, %p155_p13 }
  0x4c   : > { %p3461_p8 = por %p421_p2, %p150_p12  ;;  %p3944_p9 = scmp.lt.s32.totalorder %s3211_s5, 8 }
  0x4d   : > { %s4004_s21 = scalar_select %p3455_p4, 1, 0 }
  0x4e   : > { %2605 = dma.hbm_to_vmem [thread:$0]  (!%p3418_p5), %s4003_s12, 16, %s641_s8, [#allocation14]  }
  0x4f   : > { %4005 = sst [smem:[#allocation38_spill]] %s4004_s21  ;;  %p3468_p10 = por %p427_p7, %p3405_p1 }
  0x50   : > { %s3473_s27 = sand.u32 1, %s3191_s28   ;;  %p3477_p11 = pnand %p3944_p9, %p151_p0 }
  0x51   : > { %s4007_s8 = scalar_select %p3468_p10, 1, 0 }
  0x52   : > { %s3946_s2 = sand.u32 1, %s3211_s5   ;;  %s2301_s7 = sshll.u32 %s3207_s30, 4 }
  0x53   : > { %4008 = sst [smem:[#allocation39_spill]] %s4007_s8  ;;  %s721_s13 = scalar_lea.vmem [#allocation7], %s3473_s27 }
  0x54   : > { %s4010_s16 = sld [smem:[#allocation49_spill]]  ;;  %s728_s9 = sshll.u32 %s721_s13, 4  ;;  %s729_s9 = int_to_ptr.vmem [resolvable:$true] %s728_s9 }
  0x55   : > { %s4011_s6 = sld [smem:[#allocation50_spill]]  ;;  %s3494_s25 = scalar_lea.sflag [#allocation8], %s3946_s2 }
  0x56   : > { %p3952_p12 = pneg %p3477_p11  ;;  %s2894_s23 = scalar_lea.vmem %s729_s9, 16 }
  0x57   : > { %p2895_p13 = scmp.ne.s32.totalorder %s729_s9, %s2894_s23  ;;  %s3217_s20 = smov [#allocation7]  }
  0x58   : > { %s2899_s24 = sshll.u32 %s3217_s20, 4  ;;  %s2900_s24 = int_to_ptr.vmem [resolvable:$false] %s2899_s24 }
  0x59   : > { %p2897_p0 = pnand %p2895_p13, %p3952_p12  ;;  %s2901_s13 = scalar_lea.vmem %s2900_s24, 32 }
  0x5a   : > { %s726_s18 = scalar_lea.hbm %s4010_s16, %s2301_s7  ;;  %p2902_p7 = scmp.lt.s32.totalorder %s729_s9, %s2900_s24 }
  0x5b   : > { %s3490_s8 = scalar_lea.hbm %s4011_s6, %s2301_s7  ;;  %p2898_p2 = pneg %p2897_p0 }
  0x5c   : > { %p2903_p6 = scmp.lt.s32.totalorder %s2901_s13, %s2894_s23 }
  0x5e   : > { %p2904_p9 = por %p2903_p6, %p2902_p7 }
  0x60   : > { %p2905_p10 = pnand %p2904_p9, %p2898_p2 }
  0x62   : > { %2908 = shalt.err (!%p2905_p10)
}
  0x63   : > { %2615 = dma.hbm_to_vmem [thread:$0]  (!%p3477_p11), %s726_s18, 16, %s729_s9, %s3494_s25  }
  0x64   : > { %p4012_p13 = scmp.lt.s32.totalorder %s3211_s5, 8  ;;  %s54_s0 = sadd.s32 1, %s3203_s4 }
  0x65   : > { %p55_p9 = scmp.ge.s32.totalorder %s54_s0, 4  ;;  %s3514_s23 = sand.u32 1, %s3179_s26  }
  0x66   : > { %p3508_p6 = pnand %p4012_p13, %p3461_p8  ;;  %s2563_s16 = smul.u32 160, %s3514_s23 }
  0x67   : > { %s4086_s0 = smov (%p55_p9, %s54_s0), 0  ;;  %s4015_s7 = sadd.s32 1, %s3207_s30 }
  0x68   : > { %4014 = sst [smem:[#allocation40_spill]] %s4086_s0  ;;  %s4088_s7 = smov (!%p55_p9, %s4015_s7), %s3207_s30 }
  0x69   : > { %s411_s9 = ssub.s32 %s3203_s4, %s4086_s0  ;;  %p59_p10 = scmp.ge.s32.totalorder %s4088_s7, 2 }
  0x6a   : > { %p412_p8 = scmp.eq.s32.totalorder %s411_s9, 0  ;;  %s2564_s18 = smul.u32 2560, %s3203_s4 }
  0x6b   : > { %s756_s29 = scalar_lea.vmem [#allocation16], %s2563_s16  ;;  %s4090_s7 = smov (%p59_p10, %s4088_s7), 0 }
  0x6c   : > { %s763_s20 = sshll.u32 %s756_s29, 4  ;;  %4016 = sst [smem:[#allocation41_spill]] %s4090_s7  ;;  %s764_s20 = int_to_ptr.vmem [resolvable:$true] %s763_s20 }
  0x6d   : > { %s4017_s24 = sadd.s32 1, %s3179_s26  ;;  %s139_s2 = ssub.s32 %s3207_s30, %s4090_s7 }
  0x6e   : > { %s3530_s13 = scalar_select %p412_p8, %s3179_s26, %s4017_s24  }
  0x6f   : > { %s4019_s15 = sld [smem:[#allocation59_spill]]  ;;  %p3537_p0 = scmp.eq.s32.totalorder %s139_s2, 0 }
  0x70   : > { %4018 = sst [smem:[#allocation42_spill]] %s3530_s13  ;;  %s4021_s9 = sand.u32 1, %s3211_s5  }
  0x71   : > { %s3543_s0 = scalar_lea.sflag [#allocation17], %s4021_s9  ;;  %p3956_p2 = pneg %p3508_p6 }
  0x72   : > { %s2922_s16 = scalar_lea.vmem %s764_s20, 2560  ;;  %s3218_s29 = smov [#allocation16]  }
  0x73   : > { %p2923_p7 = scmp.ne.s32.totalorder %s764_s20, %s2922_s16  ;;  %s2927_s24 = sshll.u32 %s3218_s29, 4  ;;  %s2928_s24 = int_to_ptr.vmem [resolvable:$false] %s2927_s24 }
  0x74   : > { %s2929_s6 = scalar_lea.vmem %s2928_s24, 5120  ;;  %p2930_p10 = scmp.lt.s32.totalorder %s764_s20, %s2928_s24 }
  0x75   : > { %s762_s3 = scalar_lea.hbm %s4019_s15, %s2564_s18  ;;  %p2925_p13 = pnand %p2923_p7, %p3956_p2 }
  0x76   : > { %p2931_p8 = scmp.lt.s32.totalorder %s2929_s6, %s2922_s16 }
  0x77   : > { %p2926_p9 = pneg %p2925_p13 }
  0x78   : > { %p2932_p12 = por %p2931_p8, %p2930_p10 }
  0x7a   : > { %p2933_p1 = pnand %p2932_p12, %p2926_p9 }
  0x7c   : > { %2936 = shalt.err (!%p2933_p1)
}
  0x7d   : > { %s3959_s21 = smov 128   ;;  %s3960_s2 = smov 8  }
  0x7e   : > { %2621 = dma.hbm_to_vmem [thread:$0]  (!%p3508_p6), %s762_s3, 2560, %s764_s20, %s3543_s0, %s3959_s21, %s3959_s21, %s3960_s2  }
  0x7f   : > { %s4022_s18 = sadd.s32 1, %s3191_s28  ;;  %s3221_s16 = smov [#allocation12]  }
  0x80   : > { %s3561_s9 = scalar_select %p3537_p0, %s3191_s28, %s4022_s18  }
  0x81   : > { %s626_s29 = sshll.u32 %s3221_s16, 4  ;;  %s3222_s24 = smov [#allocation15]   ;;  %s627_s29 = int_to_ptr.vmem [resolvable:$true] %s626_s29 }
  0x82   : > { %4023 = sst [smem:[#allocation43_spill]] %s3561_s9  ;;  %s654_s6 = sshll.u32 %s3222_s24, 4  ;;  %s655_s6 = int_to_ptr.vmem [resolvable:$true] %s654_s6 }
  0x83   : > { %s2948_s15 = scalar_lea.vmem %s627_s29, 16  ;;  %p4024_p12 = pneg %p3418_p5 }
  0x84   : > { %p2949_p1 = scmp.ne.s32.totalorder %s627_s29, %s2948_s15  ;;  %s2955_s7 = scalar_lea.vmem %s627_s29, 32 }
  0x85   : > { %p2956_p9 = scmp.lt.s32.totalorder %s627_s29, %s627_s29  ;;  %p2957_p10 = scmp.lt.s32.totalorder %s2955_s7, %s2948_s15 }
  0x86   : > { %p2951_p7 = pnand %p2949_p1, %p4024_p12 }
  0x87   : > { %p2958_p8 = por %p2957_p10, %p2956_p9 }
  0x88   : > { %p2952_p13 = pneg %p2951_p7 }
  0x8a   : > { %p2959_p2 = pnand %p2958_p8, %p2952_p13 }
  0x8c   : > { %2962 = shalt.err (!%p2959_p2)
}
  0x8d   : > { %s4025_s10 = sld [smem:[#allocation54_spill]]  ;;  %s2974_s20 = scalar_lea.vmem %s655_s6, 16 }
  0x8e   : > { %p2975_p0 = scmp.ne.s32.totalorder %s655_s6, %s2974_s20  ;;  %p4026_p4 = pmov %p4024_p12 }
  0x8f   : > { %s2981_s18 = scalar_lea.vmem %s655_s6, 32  ;;  %p2982_p7 = scmp.lt.s32.totalorder %s655_s6, %s655_s6 }
  0x90   : > { %p2977_p1 = pnand %p2975_p0, %p4026_p4  ;;  %p2983_p3 = scmp.lt.s32.totalorder %s2981_s18, %s2974_s20 }
  0x92   : > { %p2978_p12 = pneg %p2977_p1  ;;  %p2984_p9 = por %p2983_p3, %p2982_p7 }
  0x93   : > { %2602 = dma.hbm_to_vmem [thread:$0]  (!%p3418_p5), %s4025_s10, 16, %s627_s29, [#allocation11]  }
  0x94   : > { %p2985_p13 = pnand %p2984_p9, %p2978_p12 }
  0x96   : > { %2988 = shalt.err (!%p2985_p13)
}
  0x97   : > { %s4027_s14 = sld [smem:[#allocation58_spill]]  ;;  %s2298_s16 = sshll.u32 %s3473_s27, 4 }
  0x98   : > { %s2408_s29 = sshll.u32 %s3207_s30, 8  ;;  %s4028_s1 = sld [smem:[#allocation47_spill]] }
  0x99   : > { %s693_s18 = scalar_lea.vmem [#allocation5], %s2298_s16  ;;  %s738_s2 = scalar_lea.vmem [#allocation9], %s3473_s27 }
  0x9a   : > { %s700_s21 = sshll.u32 %s693_s18, 4  ;;  %s745_s11 = sshll.u32 %s738_s2, 4  ;;  %s701_s21 = int_to_ptr.vmem [resolvable:$true] %s700_s21  ;;  %s746_s11 = int_to_ptr.vmem [resolvable:$true] %s745_s11 }
  0x9b   : > { %s690_s10 = scalar_lea.sflag [#allocation6], %s3473_s27  ;;  %s3002_s9 = scalar_lea.vmem %s701_s21, 256 }
  0x9c   : > { %p3003_p3 = scmp.ne.s32.totalorder %s701_s21, %s3002_s9  ;;  %p4029_p4 = pneg %p3477_p11 }
  0x9d   : > { %2608 = dma.hbm_to_vmem [thread:$0]  (!%p3418_p5), %s4027_s14, 16, %s655_s6, [#allocation14]  }
  0x9e   : > { %s699_s20 = scalar_lea.hbm %s4028_s1, %s2408_s29  ;;  %p3005_p2 = pnand %p3003_p3, %p4029_p4 }
  0x9f   : > { %s3223_s15 = smov [#allocation5]  }
  0xa0   : > { %p3006_p10 = pneg %p3005_p2  ;;  %s3007_s6 = sshll.u32 %s3223_s15, 4  ;;  %s3008_s6 = int_to_ptr.vmem [resolvable:$false] %s3007_s6 }
  0xa1   : > { %s3009_s7 = scalar_lea.vmem %s3008_s6, 512  ;;  %p3010_p5 = scmp.lt.s32.totalorder %s701_s21, %s3008_s6 }
  0xa2   : > { %p3011_p8 = scmp.lt.s32.totalorder %s3009_s7, %s3002_s9 }
  0xa4   : > { %p3012_p0 = por %p3011_p8, %p3010_p5 }
  0xa6   : > { %p3013_p1 = pnand %p3012_p0, %p3006_p10 }
  0xa8   : > { %3016 = shalt.err (!%p3013_p1)
}
  0xa9   : > { %s4030_s16 = smov 8   ;;  %s4031_s2 = smov 128  }
  0xaa   : > { %2612 = dma.hbm_to_vmem [thread:$0]  (!%p3477_p11), %s699_s20, 256, %s701_s21, %s690_s10, %s4031_s2, %s4031_s2, %s4030_s16  }
  0xab   : > { %s2304_s27 = sshll.u32 %s3514_s23, 6  ;;  %s3030_s29 = scalar_lea.vmem %s746_s11, 16 }
  0xac   : > { %p3031_p12 = scmp.ne.s32.totalorder %s746_s11, %s3030_s29  ;;  %p4032_p7 = pmov %p4029_p4 }
  0xad   : > { %s3224_s9 = smov [#allocation9]  }
  0xae   : > { %p3033_p9 = pnand %p3031_p12, %p4032_p7  ;;  %s3035_s24 = sshll.u32 %s3224_s9, 4  ;;  %s3036_s24 = int_to_ptr.vmem [resolvable:$false] %s3035_s24 }
  0xaf   : > { %s3037_s3 = scalar_lea.vmem %s3036_s24, 32  ;;  %p3038_p3 = scmp.lt.s32.totalorder %s746_s11, %s3036_s24 }
  0xb0   : > { %p3034_p13 = pneg %p3033_p9  ;;  %p3039_p4 = scmp.lt.s32.totalorder %s3037_s3, %s3030_s29 }
  0xb2   : > { %p3040_p2 = por %p3039_p4, %p3038_p3 }
  0xb4   : > { %p3041_p10 = pnand %p3040_p2, %p3034_p13 }
  0xb6   : > { %3044 = shalt.err (!%p3041_p10)
}
  0xb7   : > { %2618 = dma.hbm_to_vmem [thread:$0]  (!%p3477_p11), %s3490_s8, 16, %s746_s11, %s3494_s25  }
  0xb8   : > { %s2409_s10 = sshll.u32 %s3203_s4, 10  ;;  %s4033_s17 = sld [smem:[#allocation61_spill]] }
  0xb9   : > { %s784_s18 = scalar_lea.vmem [#allocation18], %s2304_s27  ;;  %p4034_p8 = pneg %p3508_p6 }
  0xba   : > { %s791_s15 = sshll.u32 %s784_s18, 4  ;;  %s3225_s22 = smov [#allocation18]   ;;  %s792_s15 = int_to_ptr.vmem [resolvable:$true] %s791_s15 }
  0xbb   : > { %s3058_s6 = scalar_lea.vmem %s792_s15, 1024  ;;  %s3063_s7 = sshll.u32 %s3225_s22, 4  ;;  %s3064_s7 = int_to_ptr.vmem [resolvable:$false] %s3063_s7 }
  0xbc   : > { %p3059_p5 = scmp.ne.s32.totalorder %s792_s15, %s3058_s6  ;;  %s3065_s16 = scalar_lea.vmem %s3064_s7, 2048 }
  0xbd   : > { %p3066_p11 = scmp.lt.s32.totalorder %s792_s15, %s3064_s7  ;;  %p3067_p12 = scmp.lt.s32.totalorder %s3065_s16, %s3058_s6 }
  0xbe   : > { %s790_s20 = scalar_lea.hbm %s4033_s17, %s2409_s10  ;;  %p3061_p0 = pnand %p3059_p5, %p4034_p8 }
  0xbf   : > { %p3068_p7 = por %p3067_p12, %p3066_p11 }
  0xc0   : > { %p3062_p1 = pneg %p3061_p0 }
  0xc2   : > { %p3069_p9 = pnand %p3068_p7, %p3062_p1 }
  0xc4   : > { %3072 = shalt.err (!%p3069_p9)
}
  0xc5   : > { %s4035_s25 = smov 4   ;;  %s4036_s8 = smov 64  }
  0xc6   : > { %2624 = dma.hbm_to_vmem [thread:$0]  (!%p3508_p6), %s790_s20, 1024, %s792_s15, %s3543_s0, %s4036_s8, %s4036_s8, %s4035_s25  }
  0xc7   : > { %s4037_s19 = sld [smem:[#allocation63_spill]]  ;;  %s811_s9 = scalar_lea.vmem [#allocation19], %s2304_s27 }
  0xc8   : > { %s818_s24 = sshll.u32 %s811_s9, 4  ;;  %s808_s3 = scalar_lea.sflag [#allocation20], %s3514_s23  ;;  %s819_s24 = int_to_ptr.vmem [resolvable:$true] %s818_s24 }
  0xc9   : > { %s3086_s21 = scalar_lea.vmem %s819_s24, 1024  ;;  %p4038_p3 = pmov %p4034_p8 }
  0xca   : > { %p3087_p13 = scmp.ne.s32.totalorder %s819_s24, %s3086_s21  ;;  %s3226_s1 = smov [#allocation19]  }
  0xcb   : > { %s3091_s18 = sshll.u32 %s3226_s1, 4  ;;  %s3092_s18 = int_to_ptr.vmem [resolvable:$false] %s3091_s18 }
  0xcc   : > { %p3089_p4 = pnand %p3087_p13, %p4038_p3  ;;  %s3093_s6 = scalar_lea.vmem %s3092_s18, 2048 }
  0xcd   : > { %s817_s29 = scalar_lea.hbm %s4037_s19, %s2409_s10  ;;  %p3094_p10 = scmp.lt.s32.totalorder %s819_s24, %s3092_s18 }
  0xce   : > { %p3090_p2 = pneg %p3089_p4  ;;  %p3095_p5 = scmp.lt.s32.totalorder %s3093_s6, %s3086_s21 }
  0xd0   : > { %p3096_p8 = por %p3095_p5, %p3094_p10 }
  0xd2   : > { %p3097_p0 = pnand %p3096_p8, %p3090_p2 }
  0xd4   : > { %3100 = shalt.err (!%p3097_p0)
}
  0xd5   : > { %2627 = dma.hbm_to_vmem [thread:$0]  (!%p3508_p6), %s817_s29, 1024, %s819_s24, %s808_s3, %s4036_s8, %s4036_s8, %s4035_s25  }
  0xd6   : > { %s4039_s0 = sld [smem:[#allocation37_spill]] }
  0xdc   : > { %p4040_p1 = scmp.ne.s32.totalorder %s4039_s0, 0 }
  0xdd   : > { %s4041_s23 = sld [smem:[#allocation29_spill]] (!%p4040_p1) }
  0xde   : > { %836 = sbr.rel (%p4040_p1) target bundleno = 1774 (0x6ee), region = 104  ;;  %s4042_s27 = sld [smem:[#allocation38_spill]] (!%p4040_p1) }
  0xe3   : > { %s3634_s10 = sand.u32 1, %s4041_s23  }
  0xe4   : > { %s2311_s20 = sshll.u32 %s3634_s10, 4  ;;  %s839_s15 = scalar_lea.sflag [#allocation6], %s3634_s10 }
  0xe5   : > { %s3638_s22 = scalar_lea.vmem [#allocation5], %s2311_s20  ;;  %p4043_p11 = scmp.ne.s32.totalorder %s4042_s27, 0 }
  0xe7   : > { %3146 = dma.done.wait (%p4043_p11), %s839_s15, 256  }
  0xe8   : > { %3148 = vsyncadd (%p4043_p11), %s839_s15, 4294967040  ;;  %s4044_s12 = sadd.s32 4294967295, %s3211_s5  }
  0xe9   : > { %s847_s7 = sand.u32 1, %s4044_s12  }
  0xea   : > { %s848_s16 = scalar_lea.sflag [#allocation8], %s847_s7 }
  0xeb   : > { %3150 = dma.done.wait (%p4043_p11), %s848_s16, 32  }
  0xec   : > { %3152 = vsyncadd (%p4043_p11), %s848_s16, 4294967264  ;;  %s4045_s8 = sld [smem:[#allocation36_spill]] }
  0xf2   : > { %p4046_p6 = scmp.ne.s32.totalorder %s4045_s8, 0 }
  0xf4   : > { %3154 = dma.done.wait (%p4046_p6), [#allocation11], 528  }
  0xf5   : > { %3156 = vsyncadd (%p4046_p6), [#allocation11], 4294966768 }
  0xf6   : > { %3158 = dma.done.wait (%p4046_p6), [#allocation14], 32  }
  0xf7   : > { %3160 = vsyncadd (%p4046_p6), [#allocation14], 4294967264  ;;  %s4047_s2 = sld [smem:[#allocation27_spill]]  ;;  %s880_s3 = scalar_lea.sflag [#allocation17], %s847_s7 }
  0xf8   : > { %s4048_s29 = sld [smem:[#allocation39_spill]] }
  0xfd   : > { %s881_s9 = sand.u32 1, %s4047_s2  }
  0xfe   : > { %s2565_s24 = smul.u32 160, %s881_s9  ;;  %p4049_p12 = scmp.ne.s32.totalorder %s4048_s29, 0 }
 0x100   : > { %s3661_s21 = scalar_lea.vmem [#allocation16], %s2565_s24 }
 0x101   : > { %3162 = dma.done.wait (%p4049_p12), %s880_s3, 3584  }
 0x102   : > { %3164 = vsyncadd (%p4049_p12), %s880_s3, 4294963712  ;;  %s2316_s1 = sshll.u32 %s881_s9, 6  ;;  %s898_s6 = scalar_lea.sflag [#allocation20], %s881_s9 }
 0x103   : > { %s3667_s18 = scalar_lea.vmem [#allocation18], %s2316_s1  ;;  %s3669_s0 = scalar_lea.vmem [#allocation19], %s2316_s1 }
 0x104   : > { %3166 = dma.done.wait (%p4049_p12), %s898_s6, 1024  }
 0x105   : > { %3168 = vsyncadd (%p4049_p12), %s898_s6, 4294966272  ;;  %s4050_s23 = sld [smem:[#allocation32_spill]] }
 0x106   : > { %s4051_s27 = sld [smem:[#allocation31_spill]] }
 0x107   : > { %s4053_s9 = sld [smem:[#allocation44_spill]] }
 0x108   : > { %s4054_s6 = sld [smem:[#allocation45_spill]] }
 0x109   : > { %s4055_s17 = sld [smem:[#allocation46_spill]] }
 0x10a   : > { %s4056_s28 = sld [smem:[#allocation48_spill]] }
 0x10b   : > { %p1011_p7 = scmp.lt.s32.totalorder %s4050_s23, 1  ;;  %s4057_s2 = sld [smem:[#allocation62_spill]] }
 0x10c   : > { %p1031_p9 = scmp.lt.s32.totalorder %s4051_s27, 3  ;;  %s4058_s26 = sld [smem:[#allocation60_spill]] }
 0x10d   : > { %s4092_s23 = smov (!%p1011_p7, %s4050_s23), 1  ;;  %s4059_s5 = sld [smem:[#allocation64_spill]] }
 0x10e   : > { %s3681_s20 = scalar_select %p1031_p9, %s4051_s27, 3 }
 0x10f   : > { %s2411_s15 = sshll.u32 %s4092_s23, 4  ;;  %p2327_p13 = scmp.ne.s32.totalorder %s4051_s27, 0 }
 0x110   : > { %s3691_s24 = scalar_lea.vmem %s4053_s9, %s2411_s15  ;;  %s3696_s25 = scalar_lea.vmem %s4054_s6, %s2411_s15 }
 0x111   : > { %s1025_s19 = scalar_lea.vmem %s4055_s17, %s2411_s15  ;;  %s3704_s13 = scalar_lea.vmem %s4056_s28, %s2411_s15 }
 0x112   : > { %s2326_s12 = sshll.u32 %s3681_s20, 1  ;;  %s1037_s29 = scalar_lea.vmem %s4057_s2, %s3681_s20 }
 0x113   : > { %s3714_s3 = scalar_lea.vmem %s4058_s26, %s2326_s12  ;;  %s1040_s14 = scalar_lea.vmem %s4059_s5, %s3681_s20 }
 0x114   : > { %1048 = sbr.rel (%p2327_p13) target bundleno = 618 (0x26a), region = 148  ;;  %s4060_s17 = scalar_lea.vmem (!%p2327_p13), [#allocation9], %s3634_s10 }
 0x115   : > { %s4061_s4 = sld [smem:[#allocation51_spill]] (!%p2327_p13) }
 0x116   : > { %s4063_s27 = sld [smem:[#allocation52_spill]] (!%p2327_p13) }
 0x119   : > { %v2332_v0 = vld [vmem:[%s4060_s17] ss:$0 sm:$0xff]  ;;  %v1128_v1 = vld [vmem:[%s1025_s19 + $0x8] sm:$0xff]  ;;  %v3227_v3 = vmov 1   ;;  %v3228_v4 = vmov 0   ;;  %v3229_v7 = vmov 0.0  }
 0x11a   : > { %v1127_v2 = vld [vmem:[%s1025_s19] sm:$0xff]  ;;  %2742 = vset.pattern.permute.xlu0 %v3227_v3  ;;  %2744 = vset.pattern.permute.xlu1 %v3228_v4  ;;  %v1136_v5 = vmul.f32 %v2332_v0, %v1128_v1  ;;  %1246 = vst [vmem:[#allocation3 + $0x8] sm:$0xff] %v3229_v7  ;;  %1247 = vst [vmem:[#allocation3] sm:$0xff] %v3229_v7  ;;  %v2746_v8 = vld [vmem:[#allocation10 + $0x18] sm:$0xff]   ;;  %vm3230_vm0 = vmmov 0   ;;  %vm1070_vm1 = vcmask 261120  }
 0x11b   : > { %s4062_s11 = smov %s4061_s4  ;;  %v2745_v6 = vld [vmem:[%s4061_s4 + $0x8] sm:$0xff]   ;;  %1140 = vperm.xlu0 %2742, %v2332_v0   ;;  %2463 = vmatprep.subr.bf16.mxu0 %v3229_v7  ;;  %v1135_v9 = vmul.f32 %v2332_v0, %v1127_v2  ;;  %v1051_v12 = vld [vmem:[%s3696_s25] sm:$0xff]  ;;  %v2750_v16 = vld [vmem:[#allocation10] sm:$0xff]   ;;  %vm1197_vm2 = vcmask 523264   ;;  %vm1256_vm3 = vcmask 257024  }
 0x11c   : > { %1152 = vperm.xlu1 %2744, %v1136_v5   ;;  %2471 = vmatprep.subr.bf16.mxu1 %v3229_v7  ;;  %v2747_v10 = vld [vmem:[%s4062_s11] sm:$0xff]   ;;  %v1052_v13 = vld [vmem:[%s3696_s25 + $0x8] sm:$0xff]  ;;  %v2333_v40 = vld [vmem:[#allocation12] ss:$0 sm:$0xff] }
 0x11d   : > { %2464 = vmatpush3.bf16.msra.mxu0 %v2745_v6  ;;  %2472 = vmatpush3.bf16.msra.mxu1 %v2746_v8  ;;  %v2748_v11 = vld [vmem:[#allocation10 + $0x10] sm:$0xff]   ;;  %v1053_v14 = vpack.c.bf16 %v1052_v13, %v1051_v12  ;;  %v2749_v15 = vld [vmem:[#allocation10 + $0x8] sm:$0xff]  }
 0x11e   : > { %2465 = vmatprep.subr.bf16.mxu0 %v3229_v7  ;;  %2473 = vmatprep.subr.bf16.mxu1 %v3229_v7  ;;  %v1138_v17 = vld [vmem:[%s3638_s22 + $0x8] sm:$0xff]  ;;  %v1137_v19 = vld [vmem:[%s3638_s22] sm:$0xff] }
 0x11f   : > { %2743 = vset.pattern.permute.xlu0 %v3228_v4  ;;  %2467 = vmatprep.mubr.msk.bf16.mxu0 %vm3230_vm0, %v3229_v7  ;;  %v1049_v27 = vld [vmem:[%s3691_s24] sm:$0xff]  ;;  %v1050_v32 = vld [vmem:[%s3691_s24 + $0x8] sm:$0xff] }
 0x120   : > { %1147 = vperm.xlu0 %2743, %v1135_v9   ;;  %2479 = vmatprep.mubr.msk.bf16.mxu1 %vm3230_vm0, %v3229_v7  ;;  %v2331_v29 = vld [vmem:[%s4063_s27] ss:$0 sm:$0xff] }
 0x121   : > { %2466 = vmatpush3.bf16.msra.mxu0 %v2747_v10  ;;  %2474 = vmatpush3.bf16.msra.mxu1 %v2748_v11 }
 0x122   : > { %2475 = vmatprep.subr.bf16.mxu1 %v3229_v7 }
 0x124   : > { %2468 = vmatmul.mubr.msk.bf16.vlgmr.msra.gmra.mxu0 %vm1070_vm1, %v1053_v14 }
 0x125   : > { %2476 = vmatpush3.bf16.msra.mxu1 %v2749_v15 }
 0x126   : > { %2477 = vmatprep.subr.bf16.mxu1 %v3229_v7 }
 0x129   : > { %2478 = vmatpush3.bf16.msra.mxu1 %v2750_v16 }
 0x196   : > { %v1141_v18 = vpop.permute.xlu0 %1140 }
 0x197   : > { %v1144_v20 = vmul.f32 %v1141_v18, %v1138_v17  ;;  %v1153_v21 = vpop.permute.xlu1 %1152  ;;  %v1143_v22 = vmul.f32 %v1141_v18, %v1137_v19 }
 0x199   : > { %v1156_v24 = vadd.f32 %v1153_v21, %v1144_v20 }
 0x19b   : > { %v1148_v23 = vpop.permute.xlu0 %1147 }
 0x19c   : > { %v1155_v25 = vadd.f32 %v1148_v23, %v1143_v22 }
 0x19e   : > { %v1157_v26 = vpack.c.bf16 %v1156_v24, %v1155_v25 }
 0x1a0   : > { %2480 = vmatmul.mubr.msk.bf16.vlgmr.msra.gmra.mxu1 %vm1197_vm2, %v1157_v26 }
 0x1e4   : > { %v1108_v28 = vpop.f32.mrf.mxu0 }
 0x1e5   : > { %v1115_v30 = vadd.f32 %v1108_v28, %v1049_v27 }
 0x1e6   : > { %v2469_v31 = vpop.f32.mrf.mxu0 }
 0x1e7   : > { %v1124_v33 = vadd.f32 %v2331_v29, %v1115_v30 }
 0x1e8   : > { %v1111_v34 = vpop.f32.mrf.mxu0 }
 0x1e9   : > { %v2415_v35 = vpack.c.bf16 %v1124_v33, %v1124_v33  ;;  %v1116_v36 = vadd.f32 %v1111_v34, %v1050_v32 }
 0x1ea   : > { %v2470_v37 = vpop.f32.mrf.mxu0 }
 0x1eb   : > { %1257 = vst.msk [vmem:[#allocation4 + $0x4] sm:$0xf] %vm1256_vm3, %v2415_v35  ;;  %v1125_v38 = vadd.f32 %v2331_v29, %v1116_v36 }
 0x1ed   : > { %v2416_v39 = vpack.c.bf16 %v1125_v38, %v1125_v38 }
 0x1ef   : > { %1258 = vst.msk [vmem:[#allocation4 + $0xc] sm:$0xf] %vm1256_vm3, %v2416_v39 }
 0x260   : > { %v1235_v41 = vpop.f32.mrf.mxu1 }
 0x261   : > { %v1236_v42 = vadd.f32 %v2333_v40, %v1235_v41 }
 0x262   : > { %v2481_v43 = vpop.f32.mrf.mxu1 }
 0x263   : > { %v1242_v44 = vmax.f32 %v1236_v42, 0.0 }
 0x264   : > { %v1238_v45 = vpop.f32.mrf.mxu1 }
 0x265   : > { %1244 = vst [vmem:[#allocation2] sm:$0xff] %v1242_v44  ;;  %v1239_v46 = vadd.f32 %v2333_v40, %v1238_v45 }
 0x266   : > { %v2482_v47 = vpop.f32.mrf.mxu1 }
 0x267   : > { %v1243_v48 = vmax.f32 %v1239_v46, 0.0 }
 0x269   : > { %1245 = vst [vmem:[#allocation2 + $0x8] sm:$0xff] %v1243_v48 }
 0x26a PF: > { %v2751_v49 = vld [vmem:[%s3661_s21 + $0x74] ss:$8 sps:$4 sm:$0xff]   ;;  %v2753_v50 = vld [vmem:[%s3661_s21 + $0x70] ss:$8 sps:$4 sm:$0xff]   ;;  %v2754_v51 = vld [vmem:[%s3661_s21 + $0x64] ss:$8 sps:$4 sm:$0xff]   ;;  %v1304_v23 = vlaneseq }
 0x26b   : > { %1427 = vmatprep.subr.bf16.mxu0 %v2751_v49  ;;  %v2756_v52 = vld [vmem:[%s3661_s21 + $0x60] ss:$8 sps:$4 sm:$0xff]   ;;  %v2757_v53 = vld [vmem:[%s3661_s21 + $0x54] ss:$8 sps:$4 sm:$0xff]   ;;  %v2759_v54 = vld [vmem:[%s3661_s21 + $0x50] ss:$8 sps:$4 sm:$0xff]  }
 0x26c   : > { %1428 = vmatpush1.bf16.msra.mxu0 %v2753_v50  ;;  %v2760_v55 = vld [vmem:[%s3661_s21 + $0x44] ss:$8 sps:$4 sm:$0xff]   ;;  %v2762_v56 = vld [vmem:[%s3661_s21 + $0x40] ss:$8 sps:$4 sm:$0xff]   ;;  %v2763_v57 = vld [vmem:[%s3661_s21 + $0x34] ss:$8 sps:$4 sm:$0xff]  }
 0x26d   : > { %1429 = vmatprep.subr.bf16.mxu0 %v2754_v51  ;;  %v2765_v58 = vld [vmem:[%s3661_s21 + $0x30] ss:$8 sps:$4 sm:$0xff]   ;;  %v3748_v59 = vld [vmem:[#allocation2] sm:$0xff]  ;;  %s4064_s15 = scalar_lea.vmem [#allocation7], %s3634_s10  ;;  %v2769_v4 = vld [vmem:[%s3661_s21 + $0x14] ss:$8 sps:$4 sm:$0xff]  }
 0x26e   : > { %v2766_v61 = vld [vmem:[%s3661_s21 + $0x24] ss:$8 sps:$4 sm:$0xff]   ;;  %v2768_v1 = vld [vmem:[%s3661_s21 + $0x20] ss:$8 sps:$4 sm:$0xff]   ;;  %v2771_v5 = vld [vmem:[%s3661_s21 + $0x10] ss:$8 sps:$4 sm:$0xff]  }
 0x26f   : > { %v2341_v62 = vld [vmem:[%s4064_s15] ss:$0 sm:$0xff]  ;;  %vm1423_vm4 = vcmask 261120   ;;  %v2774_v7 = vld [vmem:[%s3661_s21] ss:$8 sps:$4 sm:$0xff]   ;;  %v2784_v14 = vld [vmem:[%s3667_s18 + $0x38] sm:$0xff]  }
 0x270   : > { %1430 = vmatpush1.bf16.msra.mxu0 %v2756_v52  ;;  %v3750_v60 = vld [vmem:[#allocation2 + $0x8] sm:$0xff]  ;;  %v1268_v63 = vadd.f32 %v2341_v62, %v3748_v59  ;;  %v2780_v12 = vld [vmem:[%s3661_s21 + $0x80] ss:$8 sps:$4 sm:$0xff]   ;;  %v3231_v15 = vmov 0.0   ;;  %v2788_v19 = vld [vmem:[%s3667_s18 + $0x18] sm:$0xff]   ;;  %vm3232_vm5 = vmmov 0  }
 0x271   : > { %1431 = vmatprep.subr.bf16.mxu0 %v2757_v53  ;;  %v1269_v0 = vadd.f32 %v2341_v62, %v3750_v60  ;;  %v2772_v6 = vld [vmem:[%s3661_s21 + $0x4] ss:$8 sps:$4 sm:$0xff]   ;;  %v2775_v9 = vld [vmem:[%s3661_s21 + $0x94] ss:$8 sps:$4 sm:$0xff]   ;;  %v2777_v10 = vld [vmem:[%s3661_s21 + $0x90] ss:$8 sps:$4 sm:$0xff]   ;;  %2483 = vmatprep.subr.bf16.mxu1 %v3231_v15 }
 0x272   : > { %v2417_v2 = vpack.c.bf16 %v1268_v63, %v1268_v63  ;;  %v2783_v8 = vld [vmem:[#allocation4 + $0x4] ss:$8 sps:$4 sm:$0xff]   ;;  %2484 = vmatpush3.bf16.msra.mxu1 %v2784_v14  ;;  %v2787_v18 = vld [vmem:[%s3667_s18 + $0x20] sm:$0xff]   ;;  %2499 = vmatprep.mubr.msk.bf16.mxu1 %vm3232_vm5, %v3231_v15  ;;  %v1305_v24 = vshrl.u32 %v1304_v23, 7  ;;  %v2792_v50 = vld [vmem:[%s3669_s0 + $0x38] sm:$0xff]   ;;  %s4067_s12 = sld [smem:[#allocation31_spill]] }
 0x273   : > { %v2418_v3 = vpack.c.bf16 %v1269_v0, %v1269_v0  ;;  %2366 = vmatprep.mubr.msk.bf16.mxu0 %vm1423_vm4, %v2783_v8  ;;  %v2778_v11 = vld [vmem:[%s3661_s21 + $0x84] ss:$8 sps:$4 sm:$0xff]   ;;  %2485 = vmatprep.subr.bf16.mxu1 %v3231_v15  ;;  %v2785_v16 = vld [vmem:[%s3667_s18 + $0x30] sm:$0xff]  }
 0x274   : > { %1432 = vmatpush1.bf16.msra.mxu0 %v2759_v54  ;;  %1278 = vst [vmem:[#allocation4] sm:$0xf] %v2417_v2  ;;  %v2786_v17 = vld [vmem:[%s3667_s18 + $0x28] sm:$0xff]   ;;  %v2789_v20 = vld [vmem:[%s3667_s18 + $0x10] sm:$0xff]   ;;  %v2791_v22 = vld [vmem:[%s3667_s18] sm:$0xff]   ;;  %v1306_v25 = vsub.s32 0, %v1305_v24 }
 0x275   : > { %1433 = vmatprep.subr.bf16.mxu0 %v2760_v55  ;;  %1279 = vst [vmem:[#allocation4 + $0x8] sm:$0xf] %v2418_v3  ;;  %v2790_v21 = vld [vmem:[%s3667_s18 + $0x8] sm:$0xff]   ;;  %v1302_v26 = vld [vmem:[%s3714_s3] sm:$0x3]  ;;  %v1310_v35 = vsub.s32 1, %v1305_v24 }
 0x276   : > { %2486 = vmatpush3.bf16.msra.mxu1 %v2785_v16  ;;  %v1307_v27 = vrot.slane %v1302_v26, %v1306_v25  ;;  %v2793_v52 = vld [vmem:[%s3669_s0 + $0x30] sm:$0xff]   ;;  %v2794_v53 = vld [vmem:[%s3669_s0 + $0x28] sm:$0xff]   ;;  %v2795_v54 = vld [vmem:[%s3669_s0 + $0x20] sm:$0xff]  }
 0x277   : > { %2487 = vmatprep.subr.bf16.mxu1 %v3231_v15  ;;  %v1311_v36 = vrot.slane %v1302_v26, %v1310_v35  ;;  %v2796_v55 = vld [vmem:[%s3669_s0 + $0x18] sm:$0xff]   ;;  %v2377_v62 = vld [vmem:[%s1037_s29] ss:$0 sm:$0xff] }
 0x278   : > { %1434 = vmatpush1.bf16.msra.mxu0 %v2762_v56  ;;  %v2797_v56 = vld [vmem:[%s3669_s0 + $0x10] sm:$0xff]   ;;  %v1609_v8 = vld [vmem:[#allocation3 + $0x8] sm:$0xff]  ;;  %p2387_p3 = scmp.ne.s32.totalorder %s4067_s12, 3 }
 0x279   : > { %1435 = vmatprep.subr.bf16.mxu0 %v2763_v57  ;;  %v2798_v57 = vld [vmem:[%s3669_s0 + $0x8] sm:$0xff]   ;;  %s4068_s2 = sld [smem:[#allocation55_spill]] (!%p2387_p3) }
 0x27a   : > { %2488 = vmatpush3.bf16.msra.mxu1 %v2786_v17  ;;  %s4070_s26 = sld [smem:[#allocation57_spill]] (!%p2387_p3) }
 0x27b   : > { %2489 = vmatprep.subr.bf16.mxu1 %v3231_v15  ;;  %s4072_s28 = sld [smem:[#allocation65_spill]] (!%p2387_p3) }
 0x27c   : > { %1436 = vmatpush1.bf16.msra.mxu0 %v2765_v58  ;;  %v2781_v13 = vld [vmem:[#allocation4] ss:$8 sps:$4 sm:$0xff]  }
 0x27d   : > { %1437 = vmatprep.subr.bf16.mxu0 %v2766_v61  ;;  %v2799_v58 = vld [vmem:[%s3669_s0] sm:$0xff]  }
 0x27e   : > { %2490 = vmatpush3.bf16.msra.mxu1 %v2787_v18 }
 0x27f   : > { %2491 = vmatprep.subr.bf16.mxu1 %v3231_v15  ;;  %s4069_s9 = smov (!%p2387_p3), %s4068_s2 }
 0x280   : > { %1438 = vmatpush1.bf16.msra.mxu0 %v2768_v1  ;;  %s4071_s19 = smov (!%p2387_p3), %s4070_s26 }
 0x281   : > { %1439 = vmatprep.subr.bf16.mxu0 %v2769_v4 }
 0x282   : > { %2492 = vmatpush3.bf16.msra.mxu1 %v2788_v19 }
 0x283   : > { %2493 = vmatprep.subr.bf16.mxu1 %v3231_v15 }
 0x284   : > { %1440 = vmatpush1.bf16.msra.mxu0 %v2771_v5 }
 0x285   : > { %1441 = vmatprep.subr.bf16.mxu0 %v2772_v6 }
 0x286   : > { %2494 = vmatpush3.bf16.msra.mxu1 %v2789_v20 }
 0x287   : > { %2495 = vmatprep.subr.bf16.mxu1 %v3231_v15 }
 0x288   : > { %1442 = vmatpush1.bf16.msra.mxu0 %v2774_v7 }
 0x289   : > { %1455 = vmatprep.subr.bf16.mxu0 %v2775_v9 }
 0x28a   : > { %2496 = vmatpush3.bf16.msra.mxu1 %v2790_v21 }
 0x28b   : > { %2497 = vmatprep.subr.bf16.mxu1 %v3231_v15 }
 0x28c   : > { %1456 = vmatpush2.bf16.msra.mxu0 %v2777_v10  ;;  %v2386_v10 = vld [vmem:[%s1040_s14] ss:$0 sm:$0xff] }
 0x28d   : > { %1457 = vmatprep.subr.bf16.mxu0 %v2778_v11 }
 0x28e   : > { %2498 = vmatpush3.bf16.msra.mxu1 %v2791_v22 }
 0x28f   : > { %2503 = vmatprep.subr.bf16.mxu1 %v3231_v15 }
 0x290   : > { %1458 = vmatpush2.bf16.msra.mxu0 %v2780_v12  ;;  %v1610_v12 = vld [vmem:[#allocation3] sm:$0xff] }
 0x293   : > { %1460 = vmatmul.mubr.bf16.vlgmr.msra.gmra.mxu0 %v2781_v13 }
 0x353   : > { %v1461_v28 = vpop.f32.mrf.mxu0 }
 0x354   : > { %v1462_v29 = vadd.f32 %v1461_v28, %v1307_v27 }
 0x355   : > { %v1463_v30 = vpop.f32.mrf.mxu0 }
 0x356   : > { %v2367_v31 = vmul.f32 -1.442695, %v1462_v29  ;;  %v1464_v39 = vadd.f32 %v1463_v30, %v1311_v36 }
 0x357   : > { %v1465_v32 = vpop.f32.mrf.mxu0 }
 0x358   : > { %2800 = vpow2.f32 %v2367_v31  ;;  %v1466_v33 = vadd.f32 %v1465_v32, %v1307_v27 }
 0x359   : > { %v1467_v37 = vpop.f32.mrf.mxu0 }
 0x35a   : > { %v2368_v34 = vmul.f32 -1.442695, %v1466_v33  ;;  %v1468_v41 = vadd.f32 %v1467_v37, %v1311_v36 }
 0x35c   : > { %2802 = vpow2.f32 %v2368_v34 }
 0x35d   : > { %2804 = vtanh.f32 %v1464_v39 }
 0x365   : > { %v2801_v38 = vpop.eup %2800 }
 0x366   : > { %v1476_v40 = vadd.f32 1.0, %v2801_v38 }
 0x368   : > { %2806 = vrcp.f32 %v1476_v40 }
 0x369   : > { %v2803_v42 = vpop.eup %2802  ;;  %2808 = vtanh.f32 %v1468_v41 }
 0x36a   : > { %v1477_v43 = vadd.f32 1.0, %v2803_v42  ;;  %v2805_v44 = vpop.eup %2804 }
 0x36c   : > { %2810 = vrcp.f32 %v1477_v43 }
 0x375   : > { %v2807_v45 = vpop.eup %2806 }
 0x376   : > { %v2809_v46 = vpop.eup %2808  ;;  %v1484_v48 = vmul.f32 %v2807_v45, %v2805_v44 }
 0x379   : > { %v2811_v47 = vpop.eup %2810 }
 0x37a   : > { %v1485_v49 = vmul.f32 %v2811_v47, %v2809_v46 }
 0x37c   : > { %v1486_v51 = vpack.c.bf16 %v1485_v49, %v1484_v48 }
 0x37e   : > { %2500 = vmatmul.mubr.bf16.vlgmr.msra.gmra.mxu1 %v1486_v51 }
 0x37f   : > { %2504 = vmatpush3.bf16.msra.mxu1 %v2792_v50  ;;  %2519 = vmatprep.mubr.msk.bf16.mxu1 %vm3232_vm5, %v3231_v15 }
 0x380   : > { %2505 = vmatprep.subr.bf16.mxu1 %v3231_v15 }
 0x383   : > { %2506 = vmatpush3.bf16.msra.mxu1 %v2793_v52 }
 0x384   : > { %2507 = vmatprep.subr.bf16.mxu1 %v3231_v15 }
 0x387   : > { %2508 = vmatpush3.bf16.msra.mxu1 %v2794_v53 }
 0x388   : > { %2509 = vmatprep.subr.bf16.mxu1 %v3231_v15 }
 0x38b   : > { %2510 = vmatpush3.bf16.msra.mxu1 %v2795_v54 }
 0x38c   : > { %2511 = vmatprep.subr.bf16.mxu1 %v3231_v15 }
 0x38f   : > { %2512 = vmatpush3.bf16.msra.mxu1 %v2796_v55 }
 0x390   : > { %2513 = vmatprep.subr.bf16.mxu1 %v3231_v15 }
 0x393   : > { %2514 = vmatpush3.bf16.msra.mxu1 %v2797_v56 }
 0x394   : > { %2515 = vmatprep.subr.bf16.mxu1 %v3231_v15 }
 0x397   : > { %2516 = vmatpush3.bf16.msra.mxu1 %v2798_v57 }
 0x398   : > { %2517 = vmatprep.subr.bf16.mxu1 %v3231_v15 }
 0x39b   : > { %2518 = vmatpush3.bf16.msra.mxu1 %v2799_v58 }
 0x39e   : > { %2520 = vmatmul.mubr.bf16.vlgmr.msra.gmra.mxu1 %v1486_v51 }
 0x43e   : > { %v1587_v61 = vpop.f32.mrf.mxu1 }
 0x43f   : > { %v1594_v63 = vadd.f32 %v1587_v61, %v3748_v59 }
 0x440   : > { %v2501_v0 = vpop.f32.mrf.mxu1 }
 0x441   : > { %v1603_v1 = vadd.f32 %v2377_v62, %v1594_v63 }
 0x442   : > { %v1590_v2 = vpop.f32.mrf.mxu1 }
 0x443   : > { %v1605_v3 = vmul.f32 0.70710677, %v1603_v1  ;;  %v1595_v4 = vadd.f32 %v1590_v2, %v3750_v60 }
 0x444   : > { %v2502_v5 = vpop.f32.mrf.mxu1 }
 0x445   : > { %1607 = vst [vmem:[#allocation2] sm:$0xff] %v1605_v3  ;;  %v1604_v6 = vadd.f32 %v2377_v62, %v1595_v4 }
 0x447   : > { %v1606_v7 = vmul.f32 0.70710677, %v1604_v6 }
 0x449   : > { %1608 = vst [vmem:[#allocation2 + $0x8] sm:$0xff] %v1606_v7 }
 0x45e   : > { %v1709_v9 = vpop.f32.mrf.mxu1 }
 0x45f   : > { %v1716_v11 = vadd.f32 %v1709_v9, %v1609_v8 }
 0x460   : > { %v2521_v59 = vpop.f32.mrf.mxu1 }
 0x461   : > { %v1725_v13 = vadd.f32 %v2386_v10, %v1716_v11 }
 0x462   : > { %v1712_v14 = vpop.f32.mrf.mxu1 }
 0x463   : > { %1727 = vst [vmem:[#allocation3 + $0x8] sm:$0xff] %v1725_v13  ;;  %v1717_v15 = vadd.f32 %v1712_v14, %v1610_v12  ;;  %1732 = sbr.rel (%p2387_p3) target bundleno = 1774 (0x6ee), region = 152 }
 0x464   : > { %v2522_v60 = vpop.f32.mrf.mxu1 }
 0x465   : > { %v1726_v16 = vadd.f32 %v2386_v10, %v1717_v15 }
 0x467   : > { %1728 = vst [vmem:[#allocation3] sm:$0xff] %v1726_v16 }
 0x468   : > { %v2813_v17 = vld [vmem:[%s4068_s2 + $0x38] sm:$0xff]   ;;  %v3233_v18 = vmov 0.0   ;;  %v2814_v19 = vld [vmem:[%s4069_s9 + $0x30] sm:$0xff]   ;;  %vm3234_vm6 = vmmov 0   ;;  %v2815_v20 = vld [vmem:[%s4069_s9 + $0x28] sm:$0xff]   ;;  %v3235_v40 = vmov 0  }
 0x469   : > { %2523 = vmatprep.subr.bf16.mxu0 %v3233_v18  ;;  %2543 = vmatprep.subr.bf16.mxu1 %v3233_v18  ;;  %v2816_v21 = vld [vmem:[%s4069_s9 + $0x20] sm:$0xff]   ;;  %v2821_v22 = vld [vmem:[%s4070_s26 + $0x38] sm:$0xff]   ;;  %v2822_v23 = vld [vmem:[%s4071_s19 + $0x30] sm:$0xff]   ;;  %vm1985_vm7 = vcmask 523264   ;;  %vm1999_vm8 = vcmask 0   ;;  %s4073_s26 = scalar_lea.vmem %s4072_s28, %s4092_s23 }
 0x46a   : > { %2524 = vmatpush3.bf16.msra.mxu0 %v2813_v17  ;;  %2539 = vmatprep.mubr.msk.bf16.mxu0 %vm3234_vm6, %v3233_v18  ;;  %v2817_v24 = vld [vmem:[%s4069_s9 + $0x18] sm:$0xff]   ;;  %v2823_v25 = vld [vmem:[%s4071_s19 + $0x28] sm:$0xff]   ;;  %v2818_v26 = vld [vmem:[%s4069_s9 + $0x10] sm:$0xff]  }
 0x46b   : > { %2525 = vmatprep.subr.bf16.mxu0 %v3233_v18  ;;  %2559 = vmatprep.mubr.msk.bf16.mxu1 %vm3234_vm6, %v3233_v18  ;;  %v2824_v27 = vld [vmem:[%s4071_s19 + $0x20] sm:$0xff]   ;;  %v2819_v28 = vld [vmem:[%s4069_s9 + $0x8] sm:$0xff]   ;;  %v1733_v29 = vld [vmem:[#allocation3 + $0x8] sm:$0xff] }
 0x46c   : > { %2544 = vmatpush3.bf16.msra.mxu1 %v2821_v22  ;;  %v2825_v31 = vld [vmem:[%s4071_s19 + $0x18] sm:$0xff]   ;;  %v1735_v32 = vmul.f32 0.5, %v1733_v29  ;;  %v2820_v34 = vld [vmem:[%s4069_s9] sm:$0xff]   ;;  %v2826_v36 = vld [vmem:[%s4071_s19 + $0x10] sm:$0xff]   ;;  %2812 = vset.pattern.permute.xlu0 %v3235_v40 }
 0x46d   : > { %2545 = vmatprep.subr.bf16.mxu1 %v3233_v18  ;;  %v2827_v37 = vld [vmem:[%s4071_s19 + $0x8] sm:$0xff]   ;;  %v2828_v38 = vld [vmem:[%s4071_s19] sm:$0xff]   ;;  %v2388_v42 = vld [vmem:[#allocation13] ss:$0 sm:$0xff] }
 0x46e   : > { %2526 = vmatpush3.bf16.msra.mxu0 %v2814_v19  ;;  %v1734_v30 = vld [vmem:[#allocation3] sm:$0xff]  ;;  %v1971_v39 = vld [vmem:[%s3704_s13] sm:$0xff]  ;;  %v1972_v41 = vld [vmem:[%s3704_s13 + $0x8] sm:$0xff] }
 0x46f   : > { %2527 = vmatprep.subr.bf16.mxu0 %v3233_v18  ;;  %v1736_v33 = vmul.f32 0.5, %v1734_v30  ;;  %1975 = vperm.xlu0 %2812, %v1971_v39   ;;  %v2397_v52 = vld [vmem:[#allocation15] ss:$0 sm:$0xff]  ;;  %v1965_v54 = vld [vmem:[%s3638_s22] sm:$0xff] }
 0x470   : > { %2546 = vmatpush3.bf16.msra.mxu1 %v2822_v23  ;;  %v1966_v62 = vld [vmem:[%s3638_s22 + $0x8] sm:$0xff] }
 0x471   : > { %2547 = vmatprep.subr.bf16.mxu1 %v3233_v18  ;;  %v1737_v35 = vpack.c.bf16 %v1736_v33, %v1735_v32 }
 0x472   : > { %2528 = vmatpush3.bf16.msra.mxu0 %v2815_v20 }
 0x473   : > { %2529 = vmatprep.subr.bf16.mxu0 %v3233_v18  ;;  %1980 = vperm.xlu0 %2812, %v1972_v41  }
 0x474   : > { %2548 = vmatpush3.bf16.msra.mxu1 %v2823_v25 }
 0x475   : > { %2549 = vmatprep.subr.bf16.mxu1 %v3233_v18 }
 0x476   : > { %2530 = vmatpush3.bf16.msra.mxu0 %v2816_v21 }
 0x477   : > { %2531 = vmatprep.subr.bf16.mxu0 %v3233_v18 }
 0x478   : > { %2550 = vmatpush3.bf16.msra.mxu1 %v2824_v27 }
 0x479   : > { %2551 = vmatprep.subr.bf16.mxu1 %v3233_v18 }
 0x47a   : > { %2532 = vmatpush3.bf16.msra.mxu0 %v2817_v24 }
 0x47b   : > { %2533 = vmatprep.subr.bf16.mxu0 %v3233_v18 }
 0x47c   : > { %2552 = vmatpush3.bf16.msra.mxu1 %v2825_v31 }
 0x47d   : > { %2553 = vmatprep.subr.bf16.mxu1 %v3233_v18 }
 0x47e   : > { %2534 = vmatpush3.bf16.msra.mxu0 %v2818_v26 }
 0x47f   : > { %2535 = vmatprep.subr.bf16.mxu0 %v3233_v18 }
 0x480   : > { %2554 = vmatpush3.bf16.msra.mxu1 %v2826_v36 }
 0x481   : > { %2555 = vmatprep.subr.bf16.mxu1 %v3233_v18 }
 0x482   : > { %2536 = vmatpush3.bf16.msra.mxu0 %v2819_v28 }
 0x483   : > { %2537 = vmatprep.subr.bf16.mxu0 %v3233_v18 }
 0x484   : > { %2556 = vmatpush3.bf16.msra.mxu1 %v2827_v37 }
 0x485   : > { %2557 = vmatprep.subr.bf16.mxu1 %v3233_v18 }
 0x486   : > { %2538 = vmatpush3.bf16.msra.mxu0 %v2820_v34 }
 0x488   : > { %2558 = vmatpush3.bf16.msra.mxu1 %v2828_v38 }
 0x489   : > { %2540 = vmatmul.mubr.bf16.vlgmr.msra.gmra.mxu0 %v1737_v35 }
 0x4ea   : > { %v1976_v58 = vpop.permute.xlu0 %1975 }
 0x4ee   : > { %v1981_v5 = vpop.permute.xlu0 %1980 }
 0x549   : > { %v1843_v43 = vpop.f32.mrf.mxu0 }
 0x54a   : > { %v1844_v45 = vadd.f32 %v2388_v42, %v1843_v43 }
 0x54b   : > { %v2541_v44 = vpop.f32.mrf.mxu0 }
 0x54c   : > { %v1850_v49 = vmax.f32 %v1844_v45, 0.0 }
 0x54d   : > { %v1846_v46 = vpop.f32.mrf.mxu0 }
 0x54e   : > { %v1847_v47 = vadd.f32 %v2388_v42, %v1846_v46 }
 0x54f   : > { %v2542_v48 = vpop.f32.mrf.mxu0 }
 0x550   : > { %v1851_v50 = vmax.f32 %v1847_v47, 0.0 }
 0x552   : > { %v1852_v51 = vpack.c.bf16 %v1851_v50, %v1850_v49 }
 0x554   : > { %2560 = vmatmul.mubr.bf16.vlgmr.msra.gmra.mxu1 %v1852_v51 }
 0x614   : > { %v1958_v53 = vpop.f32.mrf.mxu1 }
 0x615   : > { %v1959_v55 = vadd.f32 %v2397_v52, %v1958_v53 }
 0x616   : > { %v2561_v56 = vpop.f32.mrf.mxu1 }
 0x617   : > { %v1967_v57 = vsub.f32 %v1965_v54, %v1959_v55 }
 0x618   : > { %v1961_v61 = vpop.f32.mrf.mxu1 }
 0x619   : > { %v1969_v63 = vand.u32 2147483647, %v1967_v57  ;;  %v1962_v0 = vadd.f32 %v2397_v52, %v1961_v61 }
 0x61a   : > { %v2562_v1 = vpop.f32.mrf.mxu1 }
 0x61b   : > { %v1968_v2 = vsub.f32 %v1966_v62, %v1962_v0  ;;  %v1983_v3 = vmul.f32 %v1976_v58, %v1969_v63 }
 0x61d   : > { %v1970_v4 = vand.u32 2147483647, %v1968_v2  ;;  %v1986_v7 = vsel %vm1985_vm7, %v1983_v3, 0.0 }
 0x61f   : > { %v1984_v6 = vmul.f32 %v1981_v5, %v1970_v4 }
 0x621   : > { %v1987_v8 = vsel %vm1985_vm7, %v1984_v6, 0.0 }
 0x622   : > { %v1988_v9 = vadd.f32 %v1987_v8, %v1986_v7 }
 0x624   : > { %1989 = vadd.xlane.f32.xlu1 %v1988_v9 }
 0x6ad   : > { %v1990_v10 = vpop.xlane.xlu1 %1989 }
 0x6ae   : > { %v1991_v11 = vrot.slane %v1990_v10, 4 }
 0x6b0   : > { %v1992_v59 = vadd.f32 %v1991_v11, %v1990_v10 }
 0x6b2   : > { %v1993_v12 = vrot.slane %v1992_v59, 2 }
 0x6b4   : > { %v1994_v13 = vadd.f32 %v1993_v12, %v1992_v59 }
 0x6b6   : > { %v1995_v14 = vrot.slane %v1994_v13, 1 }
 0x6b8   : > { %v1996_v15 = vadd.f32 %v1995_v14, %v1994_v13 }
 0x6ba   : > { %2566 = vpush %v1996_v15 }
 0x6eb   : > { %s2567_s13 = spop %2566 }
 0x6ec   : > { %v1998_v60 = vstv %s2567_s13 }
 0x6ed   : > { %2000 = vst.msk [vmem:[%s4073_s26] sm:$0x1] %vm1999_vm8, %v1998_v60 }
 0x6ee PF: > { %s4074_s4 = sld [smem:[#allocation35_spill]] }
 0x6ef   : > { %s4075_s2 = sld [smem:[#allocation27_spill]] }
 0x6f0   : > { %s4076_s25 = sld [smem:[#allocation28_spill]] }
 0x6f1   : > { %s4077_s26 = sld [smem:[#allocation42_spill]] }
 0x6f2   : > { %s4078_s27 = sld [smem:[#allocation29_spill]] }
 0x6f3   : > { %s4079_s3 = sld [smem:[#allocation30_spill]] }
 0x6f4   : > { %s45_s5 = sadd.s32 1, %s4074_s4   ;;  %s4080_s28 = sld [smem:[#allocation43_spill]] }
 0x6f5   : > { %p42_p4 = scmp.ge.s32.totalorder %s45_s5, 10   ;;  %s4081_s29 = sld [smem:[#allocation33_spill]] }
 0x6f6   : > { %s4082_s0 = sld [smem:[#allocation34_spill]] }
 0x6f7   : > { %s4083_s4 = sld [smem:[#allocation40_spill]]  ;;  %44 = sbr.rel (!%p42_p4) target bundleno = 38 (0x26), region = 250 }
 0x6f8   : > { %s4084_s30 = sld [smem:[#allocation41_spill]] }
 0x6fc   :  { %2018 = vsyncpa [#allocation6], 1 }
 0x6fd   :  { %2020 = vsyncpa [#allocation6 + $0x1], 1 }
 0x6fe   :  { %2021 = vsyncpa [#allocation8], 1 }
 0x6ff   :  { %2023 = vsyncpa [#allocation8 + $0x1], 1 }
 0x700   :  { %2024 = vsyncpa [#allocation11], 1 }
 0x701   :  { %2025 = vsyncpa [#allocation14], 1 }
 0x702   :  { %2026 = vsyncpa [#allocation17], 1 }
 0x703   :  { %2028 = vsyncpa [#allocation17 + $0x1], 1 }
 0x704   :  { %2029 = vsyncpa [#allocation20], 1 }
 0x705   :  { %2031 = vsyncpa [#allocation20 + $0x1], 1 }

</bundles_post_ra>
